<compile_context>
chip_gen: v7x
topology: tpu7x:2x2x1
jax: 0.10.0
libtpu: 0.0.40
codegen_flags: <defaults>
</compile_context>

<pallas_src>
import math

import jax
import jax.numpy as jnp
from jax import lax
from jax.experimental import pallas as pl
from jax.experimental.pallas import tpu as pltpu

# ---------------- config (matches the PyTorch module) ----------------
B = 2                 # batch
T = 8                 # context length
D = 32                # num_dims
NUM_HEADS = 4
NUM_KV_HEADS = 2
HEAD_DIM = D // NUM_HEADS              # 8
N_REP = NUM_HEADS // NUM_KV_HEADS      # 2
NUM_EXPERTS = 4
TOP_K = 2
MOE_AUX_LOSS_COEF = 0.01
RMSNORM_EPS = 1e-6

# hidden_dim exactly as FFNwMoE.__init__ computes it
_multiple_of = 4
_hidden = int(2 * D / 3)
HIDDEN_DIM = _multiple_of * ((_hidden + _multiple_of - 1) // _multiple_of)   # 24

N_TOK = B * T                          # 16
KV_DIM = NUM_KV_HEADS * HEAD_DIM       # 16
QKV_DIM = D + 2 * KV_DIM               # 64
EH = NUM_EXPERTS * HIDDEN_DIM          # 96


# ---------------- the single fused Pallas kernel ----------------
def _block_kernel(x_ref, g_attn_ref, g_ffn_ref,
                  wqkv_ref, wo_ref, wrouter_ref,
                  w1c_ref, w3c_ref, w2c_ref, expand_ref,
                  cosq_ref, sinq_ref, cosk_ref, sink_ref,
                  pswap_q_ref, pswap_k_ref,
                  out_ref, aux_ref,
                  qkv_scr, qrot_scr, krot_scr, attn_scr):
    f32 = jnp.float32
    x = x_ref[...]                                               # [N, D]

    # ---- RMSNorm (pre-attention) ----
    ms = jnp.mean(x * x, axis=-1, keepdims=True)
    xn = g_attn_ref[...] * (x * lax.rsqrt(ms + RMSNORM_EPS))

    # ---- fused QKV projection (single lane-dense matmul) ----
    qkv_scr[...] = jnp.dot(xn, wqkv_ref[...], preferred_element_type=f32)
    q = qkv_scr[:, 0:D]                                          # [N, 32]
    k = qkv_scr[:, D:D + KV_DIM]                                 # [N, 16]

    # ---- RoPE: out = x*cos + swap(x)*sin_signed (pairwise swap via const matmul) ----
    q_sw = jnp.dot(q, pswap_q_ref[...], preferred_element_type=f32)
    k_sw = jnp.dot(k, pswap_k_ref[...], preferred_element_type=f32)
    qrot_scr[...] = q * cosq_ref[...] + q_sw * sinq_ref[...]
    krot_scr[...] = k * cosk_ref[...] + k_sw * sink_ref[...]     # v is NOT rotated

    # ---- causal grouped-query attention, all (batch, head) pairs unrolled in-kernel;
    #      the wo projection is folded into the head loop so the output is written
    #      directly as a lane-dense [T, D] block per batch. ----
    scale = 1.0 / math.sqrt(HEAD_DIM)
    row = lax.broadcasted_iota(jnp.int32, (T, T), 0)
    col = lax.broadcasted_iota(jnp.int32, (T, T), 1)
    causal = row >= col
    v_base = D + KV_DIM
    for b in range(B):
        r0, r1 = b * T, (b + 1) * T
        acc = jnp.zeros((T, D), f32)
        for h in range(NUM_HEADS):
            kvh = h // N_REP                                     # grouped-query mapping
            qbh = qrot_scr[r0:r1, h * HEAD_DIM:(h + 1) * HEAD_DIM]          # [T, Dh]
            kbh = krot_scr[r0:r1, kvh * HEAD_DIM:(kvh + 1) * HEAD_DIM]      # [T, Dh]
            vbh = qkv_scr[r0:r1, v_base + kvh * HEAD_DIM:
                                 v_base + (kvh + 1) * HEAD_DIM]             # [T, Dh]
            s = jnp.dot(qbh, kbh.T, preferred_element_type=f32) * scale
            # Faithful mirror of torch: tril(attn) then masked_fill(attn == 0, -inf).
            # NOTE: a legitimate score that is exactly 0.0 is also masked (and an
            # all-masked row would NaN), exactly like the reference module.
            s = jnp.where(causal, s, 0.0)
            s = jnp.where(s == 0.0, -jnp.inf, s)
            m = jnp.max(s, axis=-1, keepdims=True)
            e = jnp.exp(s - m)
            p = e / jnp.sum(e, axis=-1, keepdims=True)
            o_bh = jnp.dot(p, vbh, preferred_element_type=f32)              # [T, Dh]
            # fold wo into the head loop: o @ wo == sum_h o_h @ wo[h*Dh:(h+1)*Dh, :]
            acc = acc + jnp.dot(o_bh, wo_ref[h * HEAD_DIM:(h + 1) * HEAD_DIM, :],
                                preferred_element_type=f32)
        attn_scr[r0:r1, :] = acc

    # ---- residual ----
    h_res = x + attn_scr[...]                                    # [N, D]

    # ---- RMSNorm (pre-FFN) ----
    ms2 = jnp.mean(h_res * h_res, axis=-1, keepdims=True)
    hn = g_ffn_ref[...] * (h_res * lax.rsqrt(ms2 + RMSNORM_EPS))

    # ---- router softmax + top-2 gate (max + masked second max, no lax.top_k) ----
    logits = jnp.dot(hn, wrouter_ref[...], preferred_element_type=f32)       # [N, E]
    lm = jnp.max(logits, axis=-1, keepdims=True)
    el = jnp.exp(logits - lm)
    probs = el / jnp.sum(el, axis=-1, keepdims=True)
    m1 = jnp.max(probs, axis=-1, keepdims=True)
    top1_mask = jnp.where(probs == m1, 1.0, 0.0)                             # [N, E]
    m2 = jnp.max(jnp.where(probs == m1, -jnp.inf, probs), axis=-1, keepdims=True)
    gate = jnp.where(probs >= m2, probs, 0.0)                                # top-2 probs

    # ---- MoE experts as three lane-dense matmuls (dense-weighted; the final
    #      contraction over [E*H] sums the per-expert contributions) ----
    h1 = jnp.dot(hn, w1c_ref[...], preferred_element_type=f32)               # [N, E*H]
    h3 = jnp.dot(hn, w3c_ref[...], preferred_element_type=f32)               # [N, E*H]
    gexp = jnp.dot(gate, expand_ref[...], preferred_element_type=f32)        # [N, E*H]
    act = (h1 * jax.nn.sigmoid(h1)) * h3 * gexp                              # silu(w1x)*w3x*gate
    moe = jnp.dot(act, w2c_ref[...], preferred_element_type=f32)             # [N, D]

    out_ref[...] = h_res + moe

    # ---- aux (load-balancing) loss: density of the top-1 assignment ----
    density = jnp.mean(top1_mask, axis=0, keepdims=True)                     # [1, E]
    rpm = jnp.mean(probs, axis=0, keepdims=True)                             # [1, E]
    aux_ref[...] = (MOE_AUX_LOSS_COEF * NUM_EXPERTS) * jnp.sum(
        density * rpm, axis=-1, keepdims=True)                               # [1, 1]


# ---------------- wrapper ----------------
def block_forward(p, x):
    # use_cache=False in this config, so start_pos / KV-cache path is a no-op.
    b, t, d = x.shape
    x2d = x.reshape(-1, d)
    out2d, aux = pl.pallas_call(
        _block_kernel,
        out_shape=(jax.ShapeDtypeStruct((b * t, d), jnp.float32),
                   jax.ShapeDtypeStruct((1, 1), jnp.float32)),
        scratch_shapes=[
            pltpu.VMEM((N_TOK, QKV_DIM), jnp.float32),   # fused qkv
            pltpu.VMEM((N_TOK, D), jnp.float32),         # rotated q
            pltpu.VMEM((N_TOK, KV_DIM), jnp.float32),    # rotated k
            pltpu.VMEM((N_TOK, D), jnp.float32),         # attention (+wo) output
        ],
    )(x2d, p["g_attn"], p["g_ffn"], p["wqkv_t"], p["wo_t"], p["wrouter_t"],
      p["w1c"], p["w3c"], p["w2c"], p["expand"],
      p["cosq"], p["sinq"], p["cosk"], p["sink"],
      p["pswap_q"], p["pswap_k"])
    return out2d.reshape(b, t, d), aux[0, 0]


# ---------------- constants / deterministic parameter init ----------------
def _rope_tables(t, head_dim, theta_base=10000.0):
    inv = 1.0 / (theta_base ** (jnp.arange(0, head_dim, 2, dtype=jnp.float32) / head_dim))
    ang = jnp.outer(jnp.arange(t, dtype=jnp.float32), inv)       # [T, Dh/2]
    cos = jnp.cos(ang)
    sin = jnp.sin(ang)
    cos_full = jnp.repeat(cos, 2, axis=-1)                        # [c0,c0,c1,c1,...]
    sin_signed = jnp.stack([-sin, sin], axis=-1).reshape(t, head_dim)  # [-s0,s0,-s1,s1,...]
    return cos_full, sin_signed


def _pair_swap(n):
    # permutation matrix P with  (x @ P)[j] = x[j ^ 1]  (swap interleaved pairs)
    idx = jnp.arange(n)
    return (idx[:, None] == (idx[None, :] ^ 1)).astype(jnp.float32)


def init_params(key):
    ks = jax.random.split(key, 10)
    scale = 0.02

    def rnd(k, shape):
        return scale * jax.random.normal(k, shape, jnp.float32)

    # raw weights in torch nn.Linear layout: [out_features, in_features]
    wq = rnd(ks[0], (D, D))
    wk = rnd(ks[1], (KV_DIM, D))
    wv = rnd(ks[2], (KV_DIM, D))
    wo = rnd(ks[3], (D, D))
    w_router = rnd(ks[4], (NUM_EXPERTS, D))
    w1 = rnd(ks[5], (NUM_EXPERTS, HIDDEN_DIM, D))
    w2 = rnd(ks[6], (NUM_EXPERTS, D, HIDDEN_DIM))
    w3 = rnd(ks[7], (NUM_EXPERTS, HIDDEN_DIM, D))

    cos_full, sin_signed = _rope_tables(T, HEAD_DIM)

    return {
        "g_attn": jnp.ones((1, D), jnp.float32),
        "g_ffn": jnp.ones((1, D), jnp.float32),
        # fused / pre-transposed projection weights ([in, out] so kernel does x @ W)
        "wqkv_t": jnp.concatenate([wq.T, wk.T, wv.T], axis=1),                      # [32, 64]
        "wo_t": wo.T,                                                                # [32, 32]
        "wrouter_t": w_router.T,                                                     # [32, 4]
        # MoE experts concatenated into lane-dense weights
        "w1c": jnp.concatenate([w1[e].T for e in range(NUM_EXPERTS)], axis=1),       # [32, 96]
        "w3c": jnp.concatenate([w3[e].T for e in range(NUM_EXPERTS)], axis=1),       # [32, 96]
        "w2c": jnp.concatenate([w2[e].T for e in range(NUM_EXPERTS)], axis=0),       # [96, 32]
        "expand": jnp.repeat(jnp.eye(NUM_EXPERTS, dtype=jnp.float32),
                             HIDDEN_DIM, axis=1),                                    # [4, 96]
        # RoPE tables expanded to the [B*T, heads*head_dim] activation layout
        "cosq": jnp.tile(jnp.tile(cos_full, (1, NUM_HEADS)), (B, 1)),                # [16, 32]
        "sinq": jnp.tile(jnp.tile(sin_signed, (1, NUM_HEADS)), (B, 1)),              # [16, 32]
        "cosk": jnp.tile(jnp.tile(cos_full, (1, NUM_KV_HEADS)), (B, 1)),             # [16, 16]
        "sink": jnp.tile(jnp.tile(sin_signed, (1, NUM_KV_HEADS)), (B, 1)),           # [16, 16]
        "pswap_q": _pair_swap(D),                                                    # [32, 32]
        "pswap_k": _pair_swap(KV_DIM),                                               # [16, 16]
    }


if __name__ == "__main__":
    root = jax.random.PRNGKey(0)
    k_params, k_x = jax.random.split(root)
    params = init_params(k_params)
    x = jax.random.normal(k_x, (B, T, D), jnp.float32)

    out, aux = jax.jit(block_forward)(params, x)
    jax.block_until_ready((out, aux))
    assert out.shape == (B, T, D)
    assert aux.shape == ()
    print("KERNEL_OK")
</pallas_src>

<mosaic_0001>
module attributes {stable_mosaic.version = 11 : i64} {
  func.func @_block_kernel(%arg0: memref<16x32xf32, #tpu.memory_space<vmem>>, %arg1: memref<1x32xf32, #tpu.memory_space<vmem>>, %arg2: memref<1x32xf32, #tpu.memory_space<vmem>>, %arg3: memref<32x64xf32, #tpu.memory_space<vmem>>, %arg4: memref<32x32xf32, #tpu.memory_space<vmem>>, %arg5: memref<32x4xf32, #tpu.memory_space<vmem>>, %arg6: memref<32x96xf32, #tpu.memory_space<vmem>>, %arg7: memref<32x96xf32, #tpu.memory_space<vmem>>, %arg8: memref<96x32xf32, #tpu.memory_space<vmem>>, %arg9: memref<4x96xf32, #tpu.memory_space<vmem>>, %arg10: memref<16x32xf32, #tpu.memory_space<vmem>>, %arg11: memref<16x32xf32, #tpu.memory_space<vmem>>, %arg12: memref<16x16xf32, #tpu.memory_space<vmem>>, %arg13: memref<16x16xf32, #tpu.memory_space<vmem>>, %arg14: memref<32x32xf32, #tpu.memory_space<vmem>>, %arg15: memref<16x16xf32, #tpu.memory_space<vmem>>, %arg16: memref<16x32xf32, #tpu.memory_space<vmem>>, %arg17: memref<1x1xf32, #tpu.memory_space<vmem>>, %arg18: memref<16x64xf32, #tpu.memory_space<vmem>>, %arg19: memref<16x32xf32, #tpu.memory_space<vmem>>, %arg20: memref<16x16xf32, #tpu.memory_space<vmem>>, %arg21: memref<16x32xf32, #tpu.memory_space<vmem>>) attributes {dimension_semantics = [], scalar_prefetch = 0 : i64, scratch_operands = 4 : i64, tpu.core_type = #tpu.core_type<tc>} {
    %c0 = arith.constant 0 : index
    %c0_0 = arith.constant 0 : index
    %0 = vector.load %arg0[%c0, %c0_0] : memref<16x32xf32, #tpu.memory_space<vmem>>, vector<16x32xf32>
    %1 = arith.mulf %0, %0 : vector<16x32xf32>
    %cst = arith.constant dense<0.000000e+00> : vector<16xf32>
    %2 = vector.multi_reduction <add>, %1, %cst [1] : vector<16x32xf32> to vector<16xf32>
    %3 = vector.shape_cast %2 : vector<16xf32> to vector<16x1xf32>
    %cst_1 = arith.constant 3.200000e+01 : f32
    %4 = vector.broadcast %cst_1 : f32 to vector<16x1xf32>
    %5 = arith.divf %3, %4 : vector<16x1xf32>
    %c0_2 = arith.constant 0 : index
    %c0_3 = arith.constant 0 : index
    %6 = vector.load %arg1[%c0_2, %c0_3] : memref<1x32xf32, #tpu.memory_space<vmem>>, vector<1x32xf32>
    %cst_4 = arith.constant 9.99999997E-7 : f32
    %7 = vector.broadcast %cst_4 : f32 to vector<16x1xf32>
    %8 = arith.addf %5, %7 : vector<16x1xf32>
    %9 = math.rsqrt %8 : vector<16x1xf32>
    %10 = vector.broadcast %9 : vector<16x1xf32> to vector<16x32xf32>
    %11 = arith.mulf %0, %10 : vector<16x32xf32>
    %12 = vector.broadcast %6 : vector<1x32xf32> to vector<16x32xf32>
    %13 = arith.mulf %12, %11 : vector<16x32xf32>
    %c0_5 = arith.constant 0 : index
    %c0_6 = arith.constant 0 : index
    %14 = vector.load %arg3[%c0_5, %c0_6] : memref<32x64xf32, #tpu.memory_space<vmem>>, vector<32x64xf32>
    %cst_7 = arith.constant dense<0.000000e+00> : vector<16x64xf32>
    %15 = tpu.matmul %13, %14, %cst_7 {dimension_numbers = #tpu.dot_dimension_numbers<[1], [0], [0], [1], [0, 0, 1, 1], [], []>} : vector<16x32xf32>, vector<32x64xf32>, vector<16x64xf32> -> vector<16x64xf32>
    %c0_8 = arith.constant 0 : index
    %c0_9 = arith.constant 0 : index
    %16 = vector.load %arg18[%c0_8, %c0_9] : memref<16x64xf32, #tpu.memory_space<vmem>>, vector<16x64xf32>
    tpu.vector_store %arg18[%c0_8, %c0_9], %15 {strides = array<i32>} : memref<16x64xf32, #tpu.memory_space<vmem>>, vector<16x64xf32>,
    %c0_10 = arith.constant 0 : index
    %c0_11 = arith.constant 0 : index
    %17 = vector.load %arg18[%c0_10, %c0_11] : memref<16x64xf32, #tpu.memory_space<vmem>>, vector<16x32xf32>
    %c0_12 = arith.constant 0 : index
    %c32 = arith.constant 32 : index
    %18 = vector.load %arg18[%c0_12, %c32] : memref<16x64xf32, #tpu.memory_space<vmem>>, vector<16x16xf32>
    %c0_13 = arith.constant 0 : index
    %c0_14 = arith.constant 0 : index
    %19 = vector.load %arg14[%c0_13, %c0_14] : memref<32x32xf32, #tpu.memory_space<vmem>>, vector<32x32xf32>
    %cst_15 = arith.constant dense<0.000000e+00> : vector<16x32xf32>
    %20 = tpu.matmul %17, %19, %cst_15 {dimension_numbers = #tpu.dot_dimension_numbers<[1], [0], [0], [1], [0, 0, 1, 1], [], []>} : vector<16x32xf32>, vector<32x32xf32>, vector<16x32xf32> -> vector<16x32xf32>
    %c0_16 = arith.constant 0 : index
    %c0_17 = arith.constant 0 : index
    %21 = vector.load %arg15[%c0_16, %c0_17] : memref<16x16xf32, #tpu.memory_space<vmem>>, vector<16x16xf32>
    %cst_18 = arith.constant dense<0.000000e+00> : vector<16x16xf32>
    %22 = tpu.matmul %18, %21, %cst_18 {dimension_numbers = #tpu.dot_dimension_numbers<[1], [0], [0], [1], [0, 0, 1, 1], [], []>} : vector<16x16xf32>, vector<16x16xf32>, vector<16x16xf32> -> vector<16x16xf32>
    %c0_19 = arith.constant 0 : index
    %c0_20 = arith.constant 0 : index
    %23 = vector.load %arg10[%c0_19, %c0_20] : memref<16x32xf32, #tpu.memory_space<vmem>>, vector<16x32xf32>
    %24 = arith.mulf %17, %23 : vector<16x32xf32>
    %c0_21 = arith.constant 0 : index
    %c0_22 = arith.constant 0 : index
    %25 = vector.load %arg11[%c0_21, %c0_22] : memref<16x32xf32, #tpu.memory_space<vmem>>, vector<16x32xf32>
    %26 = arith.mulf %20, %25 : vector<16x32xf32>
    %27 = arith.addf %24, %26 : vector<16x32xf32>
    %c0_23 = arith.constant 0 : index
    %c0_24 = arith.constant 0 : index
    %28 = vector.load %arg19[%c0_23, %c0_24] : memref<16x32xf32, #tpu.memory_space<vmem>>, vector<16x32xf32>
    tpu.vector_store %arg19[%c0_23, %c0_24], %27 {strides = array<i32>} : memref<16x32xf32, #tpu.memory_space<vmem>>, vector<16x32xf32>,
    %c0_25 = arith.constant 0 : index
    %c0_26 = arith.constant 0 : index
    %29 = vector.load %arg12[%c0_25, %c0_26] : memref<16x16xf32, #tpu.memory_space<vmem>>, vector<16x16xf32>
    %30 = arith.mulf %18, %29 : vector<16x16xf32>
    %c0_27 = arith.constant 0 : index
    %c0_28 = arith.constant 0 : index
    %31 = vector.load %arg13[%c0_27, %c0_28] : memref<16x16xf32, #tpu.memory_space<vmem>>, vector<16x16xf32>
    %32 = arith.mulf %22, %31 : vector<16x16xf32>
    %33 = arith.addf %30, %32 : vector<16x16xf32>
    %c0_29 = arith.constant 0 : index
    %c0_30 = arith.constant 0 : index
    %34 = vector.load %arg20[%c0_29, %c0_30] : memref<16x16xf32, #tpu.memory_space<vmem>>, vector<16x16xf32>
    tpu.vector_store %arg20[%c0_29, %c0_30], %33 {strides = array<i32>} : memref<16x16xf32, #tpu.memory_space<vmem>>, vector<16x16xf32>,
    %35 = tpu.iota {dimensions = array<i32: 0>} : vector<8x8xi32>
    %36 = tpu.iota {dimensions = array<i32: 1>} : vector<8x8xi32>
    %37 = arith.cmpi sge, %35, %36 : vector<8x8xi32>
    %cst_31 = arith.constant 0.000000e+00 : f32
    %38 = vector.broadcast %cst_31 : f32 to vector<8x32xf32>
    %c0_32 = arith.constant 0 : index
    %c0_33 = arith.constant 0 : index
    %39 = vector.load %arg19[%c0_32, %c0_33] : memref<16x32xf32, #tpu.memory_space<vmem>>, vector<8x8xf32>
    %c0_34 = arith.constant 0 : index
    %c0_35 = arith.constant 0 : index
    %40 = vector.load %arg20[%c0_34, %c0_35] : memref<16x16xf32, #tpu.memory_space<vmem>>, vector<8x8xf32>
    %c0_36 = arith.constant 0 : index
    %c48 = arith.constant 48 : index
    %41 = vector.load %arg18[%c0_36, %c48] : memref<16x64xf32, #tpu.memory_space<vmem>>, vector<8x8xf32>
    %42 = tpu.transpose %40, [1, 0] : vector<8x8xf32> -> vector<8x8xf32>
    %cst_37 = arith.constant dense<0.000000e+00> : vector<8x8xf32>
    %43 = tpu.matmul %39, %42, %cst_37 {dimension_numbers = #tpu.dot_dimension_numbers<[1], [0], [0], [1], [0, 0, 1, 1], [], []>} : vector<8x8xf32>, vector<8x8xf32>, vector<8x8xf32> -> vector<8x8xf32>
    %cst_38 = arith.constant 0.353553385 : f32
    %44 = vector.broadcast %cst_38 : f32 to vector<8x8xf32>
    %45 = arith.mulf %43, %44 : vector<8x8xf32>
    %cst_39 = arith.constant 0.000000e+00 : f32
    %46 = vector.broadcast %cst_39 : f32 to vector<8x8xf32>
    %47 = arith.select %37, %45, %46 : vector<8x8xi1>, vector<8x8xf32>
    %cst_40 = arith.constant 0.000000e+00 : f32
    %48 = vector.broadcast %cst_40 : f32 to vector<8x8xf32>
    %49 = arith.cmpf oeq, %47, %48 : vector<8x8xf32>
    %cst_41 = arith.constant 0xFF800000 : f32
    %50 = vector.broadcast %cst_41 : f32 to vector<8x8xf32>
    %51 = arith.select %49, %50, %47 : vector<8x8xi1>, vector<8x8xf32>
    %cst_42 = arith.constant dense<0xFF800000> : vector<8xf32>
    %52 = vector.multi_reduction <maximumf>, %51, %cst_42 [1] : vector<8x8xf32> to vector<8xf32>
    %53 = vector.shape_cast %52 : vector<8xf32> to vector<8x1xf32>
    %54 = vector.broadcast %53 : vector<8x1xf32> to vector<8x8xf32>
    %55 = arith.subf %51, %54 : vector<8x8xf32>
    %56 = math.exp %55 : vector<8x8xf32>
    %cst_43 = arith.constant dense<0.000000e+00> : vector<8xf32>
    %57 = vector.multi_reduction <add>, %56, %cst_43 [1] : vector<8x8xf32> to vector<8xf32>
    %58 = vector.shape_cast %57 : vector<8xf32> to vector<8x1xf32>
    %59 = vector.broadcast %58 : vector<8x1xf32> to vector<8x8xf32>
    %60 = arith.divf %56, %59 : vector<8x8xf32>
    %cst_44 = arith.constant dense<0.000000e+00> : vector<8x8xf32>
    %61 = tpu.matmul %60, %41, %cst_44 {dimension_numbers = #tpu.dot_dimension_numbers<[1], [0], [0], [1], [0, 0, 1, 1], [], []>} : vector<8x8xf32>, vector<8x8xf32>, vector<8x8xf32> -> vector<8x8xf32>
    %c0_45 = arith.constant 0 : index
    %c0_46 = arith.constant 0 : index
    %62 = vector.load %arg4[%c0_45, %c0_46] : memref<32x32xf32, #tpu.memory_space<vmem>>, vector<8x32xf32>
    %cst_47 = arith.constant dense<0.000000e+00> : vector<8x32xf32>
    %63 = tpu.matmul %61, %62, %cst_47 {dimension_numbers = #tpu.dot_dimension_numbers<[1], [0], [0], [1], [0, 0, 1, 1], [], []>} : vector<8x8xf32>, vector<8x32xf32>, vector<8x32xf32> -> vector<8x32xf32>
    %64 = arith.addf %38, %63 : vector<8x32xf32>
    %c0_48 = arith.constant 0 : index
    %c8 = arith.constant 8 : index
    %65 = vector.load %arg19[%c0_48, %c8] : memref<16x32xf32, #tpu.memory_space<vmem>>, vector<8x8xf32>
    %c0_49 = arith.constant 0 : index
    %c0_50 = arith.constant 0 : index
    %66 = vector.load %arg20[%c0_49, %c0_50] : memref<16x16xf32, #tpu.memory_space<vmem>>, vector<8x8xf32>
    %c0_51 = arith.constant 0 : index
    %c48_52 = arith.constant 48 : index
    %67 = vector.load %arg18[%c0_51, %c48_52] : memref<16x64xf32, #tpu.memory_space<vmem>>, vector<8x8xf32>
    %68 = tpu.transpose %66, [1, 0] : vector<8x8xf32> -> vector<8x8xf32>
    %cst_53 = arith.constant dense<0.000000e+00> : vector<8x8xf32>
    %69 = tpu.matmul %65, %68, %cst_53 {dimension_numbers = #tpu.dot_dimension_numbers<[1], [0], [0], [1], [0, 0, 1, 1], [], []>} : vector<8x8xf32>, vector<8x8xf32>, vector<8x8xf32> -> vector<8x8xf32>
    %cst_54 = arith.constant 0.353553385 : f32
    %70 = vector.broadcast %cst_54 : f32 to vector<8x8xf32>
    %71 = arith.mulf %69, %70 : vector<8x8xf32>
    %cst_55 = arith.constant 0.000000e+00 : f32
    %72 = vector.broadcast %cst_55 : f32 to vector<8x8xf32>
    %73 = arith.select %37, %71, %72 : vector<8x8xi1>, vector<8x8xf32>
    %cst_56 = arith.constant 0.000000e+00 : f32
    %74 = vector.broadcast %cst_56 : f32 to vector<8x8xf32>
    %75 = arith.cmpf oeq, %73, %74 : vector<8x8xf32>
    %cst_57 = arith.constant 0xFF800000 : f32
    %76 = vector.broadcast %cst_57 : f32 to vector<8x8xf32>
    %77 = arith.select %75, %76, %73 : vector<8x8xi1>, vector<8x8xf32>
    %cst_58 = arith.constant dense<0xFF800000> : vector<8xf32>
    %78 = vector.multi_reduction <maximumf>, %77, %cst_58 [1] : vector<8x8xf32> to vector<8xf32>
    %79 = vector.shape_cast %78 : vector<8xf32> to vector<8x1xf32>
    %80 = vector.broadcast %79 : vector<8x1xf32> to vector<8x8xf32>
    %81 = arith.subf %77, %80 : vector<8x8xf32>
    %82 = math.exp %81 : vector<8x8xf32>
    %cst_59 = arith.constant dense<0.000000e+00> : vector<8xf32>
    %83 = vector.multi_reduction <add>, %82, %cst_59 [1] : vector<8x8xf32> to vector<8xf32>
    %84 = vector.shape_cast %83 : vector<8xf32> to vector<8x1xf32>
    %85 = vector.broadcast %84 : vector<8x1xf32> to vector<8x8xf32>
    %86 = arith.divf %82, %85 : vector<8x8xf32>
    %cst_60 = arith.constant dense<0.000000e+00> : vector<8x8xf32>
    %87 = tpu.matmul %86, %67, %cst_60 {dimension_numbers = #tpu.dot_dimension_numbers<[1], [0], [0], [1], [0, 0, 1, 1], [], []>} : vector<8x8xf32>, vector<8x8xf32>, vector<8x8xf32> -> vector<8x8xf32>
    %c8_61 = arith.constant 8 : index
    %c0_62 = arith.constant 0 : index
    %88 = vector.load %arg4[%c8_61, %c0_62] : memref<32x32xf32, #tpu.memory_space<vmem>>, vector<8x32xf32>
    %cst_63 = arith.constant dense<0.000000e+00> : vector<8x32xf32>
    %89 = tpu.matmul %87, %88, %cst_63 {dimension_numbers = #tpu.dot_dimension_numbers<[1], [0], [0], [1], [0, 0, 1, 1], [], []>} : vector<8x8xf32>, vector<8x32xf32>, vector<8x32xf32> -> vector<8x32xf32>
    %90 = arith.addf %64, %89 : vector<8x32xf32>
    %c0_64 = arith.constant 0 : index
    %c16 = arith.constant 16 : index
    %91 = vector.load %arg19[%c0_64, %c16] : memref<16x32xf32, #tpu.memory_space<vmem>>, vector<8x8xf32>
    %c0_65 = arith.constant 0 : index
    %c8_66 = arith.constant 8 : index
    %92 = vector.load %arg20[%c0_65, %c8_66] : memref<16x16xf32, #tpu.memory_space<vmem>>, vector<8x8xf32>
    %c0_67 = arith.constant 0 : index
    %c56 = arith.constant 56 : index
    %93 = vector.load %arg18[%c0_67, %c56] : memref<16x64xf32, #tpu.memory_space<vmem>>, vector<8x8xf32>
    %94 = tpu.transpose %92, [1, 0] : vector<8x8xf32> -> vector<8x8xf32>
    %cst_68 = arith.constant dense<0.000000e+00> : vector<8x8xf32>
    %95 = tpu.matmul %91, %94, %cst_68 {dimension_numbers = #tpu.dot_dimension_numbers<[1], [0], [0], [1], [0, 0, 1, 1], [], []>} : vector<8x8xf32>, vector<8x8xf32>, vector<8x8xf32> -> vector<8x8xf32>
    %cst_69 = arith.constant 0.353553385 : f32
    %96 = vector.broadcast %cst_69 : f32 to vector<8x8xf32>
    %97 = arith.mulf %95, %96 : vector<8x8xf32>
    %cst_70 = arith.constant 0.000000e+00 : f32
    %98 = vector.broadcast %cst_70 : f32 to vector<8x8xf32>
    %99 = arith.select %37, %97, %98 : vector<8x8xi1>, vector<8x8xf32>
    %cst_71 = arith.constant 0.000000e+00 : f32
    %100 = vector.broadcast %cst_71 : f32 to vector<8x8xf32>
    %101 = arith.cmpf oeq, %99, %100 : vector<8x8xf32>
    %cst_72 = arith.constant 0xFF800000 : f32
    %102 = vector.broadcast %cst_72 : f32 to vector<8x8xf32>
    %103 = arith.select %101, %102, %99 : vector<8x8xi1>, vector<8x8xf32>
    %cst_73 = arith.constant dense<0xFF800000> : vector<8xf32>
    %104 = vector.multi_reduction <maximumf>, %103, %cst_73 [1] : vector<8x8xf32> to vector<8xf32>
    %105 = vector.shape_cast %104 : vector<8xf32> to vector<8x1xf32>
    %106 = vector.broadcast %105 : vector<8x1xf32> to vector<8x8xf32>
    %107 = arith.subf %103, %106 : vector<8x8xf32>
    %108 = math.exp %107 : vector<8x8xf32>
    %cst_74 = arith.constant dense<0.000000e+00> : vector<8xf32>
    %109 = vector.multi_reduction <add>, %108, %cst_74 [1] : vector<8x8xf32> to vector<8xf32>
    %110 = vector.shape_cast %109 : vector<8xf32> to vector<8x1xf32>
    %111 = vector.broadcast %110 : vector<8x1xf32> to vector<8x8xf32>
    %112 = arith.divf %108, %111 : vector<8x8xf32>
    %cst_75 = arith.constant dense<0.000000e+00> : vector<8x8xf32>
    %113 = tpu.matmul %112, %93, %cst_75 {dimension_numbers = #tpu.dot_dimension_numbers<[1], [0], [0], [1], [0, 0, 1, 1], [], []>} : vector<8x8xf32>, vector<8x8xf32>, vector<8x8xf32> -> vector<8x8xf32>
    %c16_76 = arith.constant 16 : index
    %c0_77 = arith.constant 0 : index
    %114 = vector.load %arg4[%c16_76, %c0_77] : memref<32x32xf32, #tpu.memory_space<vmem>>, vector<8x32xf32>
    %cst_78 = arith.constant dense<0.000000e+00> : vector<8x32xf32>
    %115 = tpu.matmul %113, %114, %cst_78 {dimension_numbers = #tpu.dot_dimension_numbers<[1], [0], [0], [1], [0, 0, 1, 1], [], []>} : vector<8x8xf32>, vector<8x32xf32>, vector<8x32xf32> -> vector<8x32xf32>
    %116 = arith.addf %90, %115 : vector<8x32xf32>
    %c0_79 = arith.constant 0 : index
    %c24 = arith.constant 24 : index
    %117 = vector.load %arg19[%c0_79, %c24] : memref<16x32xf32, #tpu.memory_space<vmem>>, vector<8x8xf32>
    %c0_80 = arith.constant 0 : index
    %c8_81 = arith.constant 8 : index
    %118 = vector.load %arg20[%c0_80, %c8_81] : memref<16x16xf32, #tpu.memory_space<vmem>>, vector<8x8xf32>
    %c0_82 = arith.constant 0 : index
    %c56_83 = arith.constant 56 : index
    %119 = vector.load %arg18[%c0_82, %c56_83] : memref<16x64xf32, #tpu.memory_space<vmem>>, vector<8x8xf32>
    %120 = tpu.transpose %118, [1, 0] : vector<8x8xf32> -> vector<8x8xf32>
    %cst_84 = arith.constant dense<0.000000e+00> : vector<8x8xf32>
    %121 = tpu.matmul %117, %120, %cst_84 {dimension_numbers = #tpu.dot_dimension_numbers<[1], [0], [0], [1], [0, 0, 1, 1], [], []>} : vector<8x8xf32>, vector<8x8xf32>, vector<8x8xf32> -> vector<8x8xf32>
    %cst_85 = arith.constant 0.353553385 : f32
    %122 = vector.broadcast %cst_85 : f32 to vector<8x8xf32>
    %123 = arith.mulf %121, %122 : vector<8x8xf32>
    %cst_86 = arith.constant 0.000000e+00 : f32
    %124 = vector.broadcast %cst_86 : f32 to vector<8x8xf32>
    %125 = arith.select %37, %123, %124 : vector<8x8xi1>, vector<8x8xf32>
    %cst_87 = arith.constant 0.000000e+00 : f32
    %126 = vector.broadcast %cst_87 : f32 to vector<8x8xf32>
    %127 = arith.cmpf oeq, %125, %126 : vector<8x8xf32>
    %cst_88 = arith.constant 0xFF800000 : f32
    %128 = vector.broadcast %cst_88 : f32 to vector<8x8xf32>
    %129 = arith.select %127, %128, %125 : vector<8x8xi1>, vector<8x8xf32>
    %cst_89 = arith.constant dense<0xFF800000> : vector<8xf32>
    %130 = vector.multi_reduction <maximumf>, %129, %cst_89 [1] : vector<8x8xf32> to vector<8xf32>
    %131 = vector.shape_cast %130 : vector<8xf32> to vector<8x1xf32>
    %132 = vector.broadcast %131 : vector<8x1xf32> to vector<8x8xf32>
    %133 = arith.subf %129, %132 : vector<8x8xf32>
    %134 = math.exp %133 : vector<8x8xf32>
    %cst_90 = arith.constant dense<0.000000e+00> : vector<8xf32>
    %135 = vector.multi_reduction <add>, %134, %cst_90 [1] : vector<8x8xf32> to vector<8xf32>
    %136 = vector.shape_cast %135 : vector<8xf32> to vector<8x1xf32>
    %137 = vector.broadcast %136 : vector<8x1xf32> to vector<8x8xf32>
    %138 = arith.divf %134, %137 : vector<8x8xf32>
    %cst_91 = arith.constant dense<0.000000e+00> : vector<8x8xf32>
    %139 = tpu.matmul %138, %119, %cst_91 {dimension_numbers = #tpu.dot_dimension_numbers<[1], [0], [0], [1], [0, 0, 1, 1], [], []>} : vector<8x8xf32>, vector<8x8xf32>, vector<8x8xf32> -> vector<8x8xf32>
    %c24_92 = arith.constant 24 : index
    %c0_93 = arith.constant 0 : index
    %140 = vector.load %arg4[%c24_92, %c0_93] : memref<32x32xf32, #tpu.memory_space<vmem>>, vector<8x32xf32>
    %cst_94 = arith.constant dense<0.000000e+00> : vector<8x32xf32>
    %141 = tpu.matmul %139, %140, %cst_94 {dimension_numbers = #tpu.dot_dimension_numbers<[1], [0], [0], [1], [0, 0, 1, 1], [], []>} : vector<8x8xf32>, vector<8x32xf32>, vector<8x32xf32> -> vector<8x32xf32>
    %142 = arith.addf %116, %141 : vector<8x32xf32>
    %c0_95 = arith.constant 0 : index
    %c0_96 = arith.constant 0 : index
    %143 = vector.load %arg21[%c0_95, %c0_96] : memref<16x32xf32, #tpu.memory_space<vmem>>, vector<8x32xf32>
    tpu.vector_store %arg21[%c0_95, %c0_96], %142 {strides = array<i32>} : memref<16x32xf32, #tpu.memory_space<vmem>>, vector<8x32xf32>,
    %cst_97 = arith.constant 0.000000e+00 : f32
    %144 = vector.broadcast %cst_97 : f32 to vector<8x32xf32>
    %c8_98 = arith.constant 8 : index
    %c0_99 = arith.constant 0 : index
    %145 = vector.load %arg19[%c8_98, %c0_99] : memref<16x32xf32, #tpu.memory_space<vmem>>, vector<8x8xf32>
    %c8_100 = arith.constant 8 : index
    %c0_101 = arith.constant 0 : index
    %146 = vector.load %arg20[%c8_100, %c0_101] : memref<16x16xf32, #tpu.memory_space<vmem>>, vector<8x8xf32>
    %c8_102 = arith.constant 8 : index
    %c48_103 = arith.constant 48 : index
    %147 = vector.load %arg18[%c8_102, %c48_103] : memref<16x64xf32, #tpu.memory_space<vmem>>, vector<8x8xf32>
    %148 = tpu.transpose %146, [1, 0] : vector<8x8xf32> -> vector<8x8xf32>
    %cst_104 = arith.constant dense<0.000000e+00> : vector<8x8xf32>
    %149 = tpu.matmul %145, %148, %cst_104 {dimension_numbers = #tpu.dot_dimension_numbers<[1], [0], [0], [1], [0, 0, 1, 1], [], []>} : vector<8x8xf32>, vector<8x8xf32>, vector<8x8xf32> -> vector<8x8xf32>
    %cst_105 = arith.constant 0.353553385 : f32
    %150 = vector.broadcast %cst_105 : f32 to vector<8x8xf32>
    %151 = arith.mulf %149, %150 : vector<8x8xf32>
    %cst_106 = arith.constant 0.000000e+00 : f32
    %152 = vector.broadcast %cst_106 : f32 to vector<8x8xf32>
    %153 = arith.select %37, %151, %152 : vector<8x8xi1>, vector<8x8xf32>
    %cst_107 = arith.constant 0.000000e+00 : f32
    %154 = vector.broadcast %cst_107 : f32 to vector<8x8xf32>
    %155 = arith.cmpf oeq, %153, %154 : vector<8x8xf32>
    %cst_108 = arith.constant 0xFF800000 : f32
    %156 = vector.broadcast %cst_108 : f32 to vector<8x8xf32>
    %157 = arith.select %155, %156, %153 : vector<8x8xi1>, vector<8x8xf32>
    %cst_109 = arith.constant dense<0xFF800000> : vector<8xf32>
    %158 = vector.multi_reduction <maximumf>, %157, %cst_109 [1] : vector<8x8xf32> to vector<8xf32>
    %159 = vector.shape_cast %158 : vector<8xf32> to vector<8x1xf32>
    %160 = vector.broadcast %159 : vector<8x1xf32> to vector<8x8xf32>
    %161 = arith.subf %157, %160 : vector<8x8xf32>
    %162 = math.exp %161 : vector<8x8xf32>
    %cst_110 = arith.constant dense<0.000000e+00> : vector<8xf32>
    %163 = vector.multi_reduction <add>, %162, %cst_110 [1] : vector<8x8xf32> to vector<8xf32>
    %164 = vector.shape_cast %163 : vector<8xf32> to vector<8x1xf32>
    %165 = vector.broadcast %164 : vector<8x1xf32> to vector<8x8xf32>
    %166 = arith.divf %162, %165 : vector<8x8xf32>
    %cst_111 = arith.constant dense<0.000000e+00> : vector<8x8xf32>
    %167 = tpu.matmul %166, %147, %cst_111 {dimension_numbers = #tpu.dot_dimension_numbers<[1], [0], [0], [1], [0, 0, 1, 1], [], []>} : vector<8x8xf32>, vector<8x8xf32>, vector<8x8xf32> -> vector<8x8xf32>
    %c0_112 = arith.constant 0 : index
    %c0_113 = arith.constant 0 : index
    %168 = vector.load %arg4[%c0_112, %c0_113] : memref<32x32xf32, #tpu.memory_space<vmem>>, vector<8x32xf32>
    %cst_114 = arith.constant dense<0.000000e+00> : vector<8x32xf32>
    %169 = tpu.matmul %167, %168, %cst_114 {dimension_numbers = #tpu.dot_dimension_numbers<[1], [0], [0], [1], [0, 0, 1, 1], [], []>} : vector<8x8xf32>, vector<8x32xf32>, vector<8x32xf32> -> vector<8x32xf32>
    %170 = arith.addf %144, %169 : vector<8x32xf32>
    %c8_115 = arith.constant 8 : index
    %c8_116 = arith.constant 8 : index
    %171 = vector.load %arg19[%c8_115, %c8_116] : memref<16x32xf32, #tpu.memory_space<vmem>>, vector<8x8xf32>
    %c8_117 = arith.constant 8 : index
    %c0_118 = arith.constant 0 : index
    %172 = vector.load %arg20[%c8_117, %c0_118] : memref<16x16xf32, #tpu.memory_space<vmem>>, vector<8x8xf32>
    %c8_119 = arith.constant 8 : index
    %c48_120 = arith.constant 48 : index
    %173 = vector.load %arg18[%c8_119, %c48_120] : memref<16x64xf32, #tpu.memory_space<vmem>>, vector<8x8xf32>
    %174 = tpu.transpose %172, [1, 0] : vector<8x8xf32> -> vector<8x8xf32>
    %cst_121 = arith.constant dense<0.000000e+00> : vector<8x8xf32>
    %175 = tpu.matmul %171, %174, %cst_121 {dimension_numbers = #tpu.dot_dimension_numbers<[1], [0], [0], [1], [0, 0, 1, 1], [], []>} : vector<8x8xf32>, vector<8x8xf32>, vector<8x8xf32> -> vector<8x8xf32>
    %cst_122 = arith.constant 0.353553385 : f32
    %176 = vector.broadcast %cst_122 : f32 to vector<8x8xf32>
    %177 = arith.mulf %175, %176 : vector<8x8xf32>
    %cst_123 = arith.constant 0.000000e+00 : f32
    %178 = vector.broadcast %cst_123 : f32 to vector<8x8xf32>
    %179 = arith.select %37, %177, %178 : vector<8x8xi1>, vector<8x8xf32>
    %cst_124 = arith.constant 0.000000e+00 : f32
    %180 = vector.broadcast %cst_124 : f32 to vector<8x8xf32>
    %181 = arith.cmpf oeq, %179, %180 : vector<8x8xf32>
    %cst_125 = arith.constant 0xFF800000 : f32
    %182 = vector.broadcast %cst_125 : f32 to vector<8x8xf32>
    %183 = arith.select %181, %182, %179 : vector<8x8xi1>, vector<8x8xf32>
    %cst_126 = arith.constant dense<0xFF800000> : vector<8xf32>
    %184 = vector.multi_reduction <maximumf>, %183, %cst_126 [1] : vector<8x8xf32> to vector<8xf32>
    %185 = vector.shape_cast %184 : vector<8xf32> to vector<8x1xf32>
    %186 = vector.broadcast %185 : vector<8x1xf32> to vector<8x8xf32>
    %187 = arith.subf %183, %186 : vector<8x8xf32>
    %188 = math.exp %187 : vector<8x8xf32>
    %cst_127 = arith.constant dense<0.000000e+00> : vector<8xf32>
    %189 = vector.multi_reduction <add>, %188, %cst_127 [1] : vector<8x8xf32> to vector<8xf32>
    %190 = vector.shape_cast %189 : vector<8xf32> to vector<8x1xf32>
    %191 = vector.broadcast %190 : vector<8x1xf32> to vector<8x8xf32>
    %192 = arith.divf %188, %191 : vector<8x8xf32>
    %cst_128 = arith.constant dense<0.000000e+00> : vector<8x8xf32>
    %193 = tpu.matmul %192, %173, %cst_128 {dimension_numbers = #tpu.dot_dimension_numbers<[1], [0], [0], [1], [0, 0, 1, 1], [], []>} : vector<8x8xf32>, vector<8x8xf32>, vector<8x8xf32> -> vector<8x8xf32>
    %c8_129 = arith.constant 8 : index
    %c0_130 = arith.constant 0 : index
    %194 = vector.load %arg4[%c8_129, %c0_130] : memref<32x32xf32, #tpu.memory_space<vmem>>, vector<8x32xf32>
    %cst_131 = arith.constant dense<0.000000e+00> : vector<8x32xf32>
    %195 = tpu.matmul %193, %194, %cst_131 {dimension_numbers = #tpu.dot_dimension_numbers<[1], [0], [0], [1], [0, 0, 1, 1], [], []>} : vector<8x8xf32>, vector<8x32xf32>, vector<8x32xf32> -> vector<8x32xf32>
    %196 = arith.addf %170, %195 : vector<8x32xf32>
    %c8_132 = arith.constant 8 : index
    %c16_133 = arith.constant 16 : index
    %197 = vector.load %arg19[%c8_132, %c16_133] : memref<16x32xf32, #tpu.memory_space<vmem>>, vector<8x8xf32>
    %c8_134 = arith.constant 8 : index
    %c8_135 = arith.constant 8 : index
    %198 = vector.load %arg20[%c8_134, %c8_135] : memref<16x16xf32, #tpu.memory_space<vmem>>, vector<8x8xf32>
    %c8_136 = arith.constant 8 : index
    %c56_137 = arith.constant 56 : index
    %199 = vector.load %arg18[%c8_136, %c56_137] : memref<16x64xf32, #tpu.memory_space<vmem>>, vector<8x8xf32>
    %200 = tpu.transpose %198, [1, 0] : vector<8x8xf32> -> vector<8x8xf32>
    %cst_138 = arith.constant dense<0.000000e+00> : vector<8x8xf32>
    %201 = tpu.matmul %197, %200, %cst_138 {dimension_numbers = #tpu.dot_dimension_numbers<[1], [0], [0], [1], [0, 0, 1, 1], [], []>} : vector<8x8xf32>, vector<8x8xf32>, vector<8x8xf32> -> vector<8x8xf32>
    %cst_139 = arith.constant 0.353553385 : f32
    %202 = vector.broadcast %cst_139 : f32 to vector<8x8xf32>
    %203 = arith.mulf %201, %202 : vector<8x8xf32>
    %cst_140 = arith.constant 0.000000e+00 : f32
    %204 = vector.broadcast %cst_140 : f32 to vector<8x8xf32>
    %205 = arith.select %37, %203, %204 : vector<8x8xi1>, vector<8x8xf32>
    %cst_141 = arith.constant 0.000000e+00 : f32
    %206 = vector.broadcast %cst_141 : f32 to vector<8x8xf32>
    %207 = arith.cmpf oeq, %205, %206 : vector<8x8xf32>
    %cst_142 = arith.constant 0xFF800000 : f32
    %208 = vector.broadcast %cst_142 : f32 to vector<8x8xf32>
    %209 = arith.select %207, %208, %205 : vector<8x8xi1>, vector<8x8xf32>
    %cst_143 = arith.constant dense<0xFF800000> : vector<8xf32>
    %210 = vector.multi_reduction <maximumf>, %209, %cst_143 [1] : vector<8x8xf32> to vector<8xf32>
    %211 = vector.shape_cast %210 : vector<8xf32> to vector<8x1xf32>
    %212 = vector.broadcast %211 : vector<8x1xf32> to vector<8x8xf32>
    %213 = arith.subf %209, %212 : vector<8x8xf32>
    %214 = math.exp %213 : vector<8x8xf32>
    %cst_144 = arith.constant dense<0.000000e+00> : vector<8xf32>
    %215 = vector.multi_reduction <add>, %214, %cst_144 [1] : vector<8x8xf32> to vector<8xf32>
    %216 = vector.shape_cast %215 : vector<8xf32> to vector<8x1xf32>
    %217 = vector.broadcast %216 : vector<8x1xf32> to vector<8x8xf32>
    %218 = arith.divf %214, %217 : vector<8x8xf32>
    %cst_145 = arith.constant dense<0.000000e+00> : vector<8x8xf32>
    %219 = tpu.matmul %218, %199, %cst_145 {dimension_numbers = #tpu.dot_dimension_numbers<[1], [0], [0], [1], [0, 0, 1, 1], [], []>} : vector<8x8xf32>, vector<8x8xf32>, vector<8x8xf32> -> vector<8x8xf32>
    %c16_146 = arith.constant 16 : index
    %c0_147 = arith.constant 0 : index
    %220 = vector.load %arg4[%c16_146, %c0_147] : memref<32x32xf32, #tpu.memory_space<vmem>>, vector<8x32xf32>
    %cst_148 = arith.constant dense<0.000000e+00> : vector<8x32xf32>
    %221 = tpu.matmul %219, %220, %cst_148 {dimension_numbers = #tpu.dot_dimension_numbers<[1], [0], [0], [1], [0, 0, 1, 1], [], []>} : vector<8x8xf32>, vector<8x32xf32>, vector<8x32xf32> -> vector<8x32xf32>
    %222 = arith.addf %196, %221 : vector<8x32xf32>
    %c8_149 = arith.constant 8 : index
    %c24_150 = arith.constant 24 : index
    %223 = vector.load %arg19[%c8_149, %c24_150] : memref<16x32xf32, #tpu.memory_space<vmem>>, vector<8x8xf32>
    %c8_151 = arith.constant 8 : index
    %c8_152 = arith.constant 8 : index
    %224 = vector.load %arg20[%c8_151, %c8_152] : memref<16x16xf32, #tpu.memory_space<vmem>>, vector<8x8xf32>
    %c8_153 = arith.constant 8 : index
    %c56_154 = arith.constant 56 : index
    %225 = vector.load %arg18[%c8_153, %c56_154] : memref<16x64xf32, #tpu.memory_space<vmem>>, vector<8x8xf32>
    %226 = tpu.transpose %224, [1, 0] : vector<8x8xf32> -> vector<8x8xf32>
    %cst_155 = arith.constant dense<0.000000e+00> : vector<8x8xf32>
    %227 = tpu.matmul %223, %226, %cst_155 {dimension_numbers = #tpu.dot_dimension_numbers<[1], [0], [0], [1], [0, 0, 1, 1], [], []>} : vector<8x8xf32>, vector<8x8xf32>, vector<8x8xf32> -> vector<8x8xf32>
    %cst_156 = arith.constant 0.353553385 : f32
    %228 = vector.broadcast %cst_156 : f32 to vector<8x8xf32>
    %229 = arith.mulf %227, %228 : vector<8x8xf32>
    %cst_157 = arith.constant 0.000000e+00 : f32
    %230 = vector.broadcast %cst_157 : f32 to vector<8x8xf32>
    %231 = arith.select %37, %229, %230 : vector<8x8xi1>, vector<8x8xf32>
    %cst_158 = arith.constant 0.000000e+00 : f32
    %232 = vector.broadcast %cst_158 : f32 to vector<8x8xf32>
    %233 = arith.cmpf oeq, %231, %232 : vector<8x8xf32>
    %cst_159 = arith.constant 0xFF800000 : f32
    %234 = vector.broadcast %cst_159 : f32 to vector<8x8xf32>
    %235 = arith.select %233, %234, %231 : vector<8x8xi1>, vector<8x8xf32>
    %cst_160 = arith.constant dense<0xFF800000> : vector<8xf32>
    %236 = vector.multi_reduction <maximumf>, %235, %cst_160 [1] : vector<8x8xf32> to vector<8xf32>
    %237 = vector.shape_cast %236 : vector<8xf32> to vector<8x1xf32>
    %238 = vector.broadcast %237 : vector<8x1xf32> to vector<8x8xf32>
    %239 = arith.subf %235, %238 : vector<8x8xf32>
    %240 = math.exp %239 : vector<8x8xf32>
    %cst_161 = arith.constant dense<0.000000e+00> : vector<8xf32>
    %241 = vector.multi_reduction <add>, %240, %cst_161 [1] : vector<8x8xf32> to vector<8xf32>
    %242 = vector.shape_cast %241 : vector<8xf32> to vector<8x1xf32>
    %243 = vector.broadcast %242 : vector<8x1xf32> to vector<8x8xf32>
    %244 = arith.divf %240, %243 : vector<8x8xf32>
    %cst_162 = arith.constant dense<0.000000e+00> : vector<8x8xf32>
    %245 = tpu.matmul %244, %225, %cst_162 {dimension_numbers = #tpu.dot_dimension_numbers<[1], [0], [0], [1], [0, 0, 1, 1], [], []>} : vector<8x8xf32>, vector<8x8xf32>, vector<8x8xf32> -> vector<8x8xf32>
    %c24_163 = arith.constant 24 : index
    %c0_164 = arith.constant 0 : index
    %246 = vector.load %arg4[%c24_163, %c0_164] : memref<32x32xf32, #tpu.memory_space<vmem>>, vector<8x32xf32>
    %cst_165 = arith.constant dense<0.000000e+00> : vector<8x32xf32>
    %247 = tpu.matmul %245, %246, %cst_165 {dimension_numbers = #tpu.dot_dimension_numbers<[1], [0], [0], [1], [0, 0, 1, 1], [], []>} : vector<8x8xf32>, vector<8x32xf32>, vector<8x32xf32> -> vector<8x32xf32>
    %248 = arith.addf %222, %247 : vector<8x32xf32>
    %c8_166 = arith.constant 8 : index
    %c0_167 = arith.constant 0 : index
    %249 = vector.load %arg21[%c8_166, %c0_167] : memref<16x32xf32, #tpu.memory_space<vmem>>, vector<8x32xf32>
    tpu.vector_store %arg21[%c8_166, %c0_167], %248 {strides = array<i32>} : memref<16x32xf32, #tpu.memory_space<vmem>>, vector<8x32xf32>,
    %c0_168 = arith.constant 0 : index
    %c0_169 = arith.constant 0 : index
    %250 = vector.load %arg21[%c0_168, %c0_169] : memref<16x32xf32, #tpu.memory_space<vmem>>, vector<16x32xf32>
    %251 = arith.addf %0, %250 : vector<16x32xf32>
    %252 = arith.mulf %251, %251 : vector<16x32xf32>
    %cst_170 = arith.constant dense<0.000000e+00> : vector<16xf32>
    %253 = vector.multi_reduction <add>, %252, %cst_170 [1] : vector<16x32xf32> to vector<16xf32>
    %254 = vector.shape_cast %253 : vector<16xf32> to vector<16x1xf32>
    %cst_171 = arith.constant 3.200000e+01 : f32
    %255 = vector.broadcast %cst_171 : f32 to vector<16x1xf32>
    %256 = arith.divf %254, %255 : vector<16x1xf32>
    %c0_172 = arith.constant 0 : index
    %c0_173 = arith.constant 0 : index
    %257 = vector.load %arg2[%c0_172, %c0_173] : memref<1x32xf32, #tpu.memory_space<vmem>>, vector<1x32xf32>
    %cst_174 = arith.constant 9.99999997E-7 : f32
    %258 = vector.broadcast %cst_174 : f32 to vector<16x1xf32>
    %259 = arith.addf %256, %258 : vector<16x1xf32>
    %260 = math.rsqrt %259 : vector<16x1xf32>
    %261 = vector.broadcast %260 : vector<16x1xf32> to vector<16x32xf32>
    %262 = arith.mulf %251, %261 : vector<16x32xf32>
    %263 = vector.broadcast %257 : vector<1x32xf32> to vector<16x32xf32>
    %264 = arith.mulf %263, %262 : vector<16x32xf32>
    %c0_175 = arith.constant 0 : index
    %c0_176 = arith.constant 0 : index
    %265 = vector.load %arg5[%c0_175, %c0_176] : memref<32x4xf32, #tpu.memory_space<vmem>>, vector<32x4xf32>
    %cst_177 = arith.constant dense<0.000000e+00> : vector<16x4xf32>
    %266 = tpu.matmul %264, %265, %cst_177 {dimension_numbers = #tpu.dot_dimension_numbers<[1], [0], [0], [1], [0, 0, 1, 1], [], []>} : vector<16x32xf32>, vector<32x4xf32>, vector<16x4xf32> -> vector<16x4xf32>
    %cst_178 = arith.constant dense<0xFF800000> : vector<16xf32>
    %267 = vector.multi_reduction <maximumf>, %266, %cst_178 [1] : vector<16x4xf32> to vector<16xf32>
    %268 = vector.shape_cast %267 : vector<16xf32> to vector<16x1xf32>
    %269 = vector.broadcast %268 : vector<16x1xf32> to vector<16x4xf32>
    %270 = arith.subf %266, %269 : vector<16x4xf32>
    %271 = math.exp %270 : vector<16x4xf32>
    %cst_179 = arith.constant dense<0.000000e+00> : vector<16xf32>
    %272 = vector.multi_reduction <add>, %271, %cst_179 [1] : vector<16x4xf32> to vector<16xf32>
    %273 = vector.shape_cast %272 : vector<16xf32> to vector<16x1xf32>
    %274 = vector.broadcast %273 : vector<16x1xf32> to vector<16x4xf32>
    %275 = arith.divf %271, %274 : vector<16x4xf32>
    %cst_180 = arith.constant dense<0xFF800000> : vector<16xf32>
    %276 = vector.multi_reduction <maximumf>, %275, %cst_180 [1] : vector<16x4xf32> to vector<16xf32>
    %277 = vector.shape_cast %276 : vector<16xf32> to vector<16x1xf32>
    %278 = vector.broadcast %277 : vector<16x1xf32> to vector<16x4xf32>
    %279 = arith.cmpf oeq, %275, %278 : vector<16x4xf32>
    %cst_181 = arith.constant 1.000000e+00 : f32
    %cst_182 = arith.constant 0.000000e+00 : f32
    %280 = vector.broadcast %cst_181 : f32 to vector<16x4xf32>
    %281 = vector.broadcast %cst_182 : f32 to vector<16x4xf32>
    %282 = arith.select %279, %280, %281 : vector<16x4xi1>, vector<16x4xf32>
    %283 = vector.broadcast %277 : vector<16x1xf32> to vector<16x4xf32>
    %284 = arith.cmpf oeq, %275, %283 : vector<16x4xf32>
    %cst_183 = arith.constant 0xFF800000 : f32
    %285 = vector.broadcast %cst_183 : f32 to vector<16x4xf32>
    %286 = arith.select %284, %285, %275 : vector<16x4xi1>, vector<16x4xf32>
    %cst_184 = arith.constant dense<0xFF800000> : vector<16xf32>
    %287 = vector.multi_reduction <maximumf>, %286, %cst_184 [1] : vector<16x4xf32> to vector<16xf32>
    %288 = vector.shape_cast %287 : vector<16xf32> to vector<16x1xf32>
    %289 = vector.broadcast %288 : vector<16x1xf32> to vector<16x4xf32>
    %290 = arith.cmpf oge, %275, %289 : vector<16x4xf32>
    %cst_185 = arith.constant 0.000000e+00 : f32
    %291 = vector.broadcast %cst_185 : f32 to vector<16x4xf32>
    %292 = arith.select %290, %275, %291 : vector<16x4xi1>, vector<16x4xf32>
    %c0_186 = arith.constant 0 : index
    %c0_187 = arith.constant 0 : index
    %293 = vector.load %arg6[%c0_186, %c0_187] : memref<32x96xf32, #tpu.memory_space<vmem>>, vector<32x96xf32>
    %cst_188 = arith.constant dense<0.000000e+00> : vector<16x96xf32>
    %294 = tpu.matmul %264, %293, %cst_188 {dimension_numbers = #tpu.dot_dimension_numbers<[1], [0], [0], [1], [0, 0, 1, 1], [], []>} : vector<16x32xf32>, vector<32x96xf32>, vector<16x96xf32> -> vector<16x96xf32>
    %c0_189 = arith.constant 0 : index
    %c0_190 = arith.constant 0 : index
    %295 = vector.load %arg7[%c0_189, %c0_190] : memref<32x96xf32, #tpu.memory_space<vmem>>, vector<32x96xf32>
    %cst_191 = arith.constant dense<0.000000e+00> : vector<16x96xf32>
    %296 = tpu.matmul %264, %295, %cst_191 {dimension_numbers = #tpu.dot_dimension_numbers<[1], [0], [0], [1], [0, 0, 1, 1], [], []>} : vector<16x32xf32>, vector<32x96xf32>, vector<16x96xf32> -> vector<16x96xf32>
    %c0_192 = arith.constant 0 : index
    %c0_193 = arith.constant 0 : index
    %297 = vector.load %arg9[%c0_192, %c0_193] : memref<4x96xf32, #tpu.memory_space<vmem>>, vector<4x96xf32>
    %cst_194 = arith.constant dense<0.000000e+00> : vector<16x96xf32>
    %298 = tpu.matmul %292, %297, %cst_194 {dimension_numbers = #tpu.dot_dimension_numbers<[1], [0], [0], [1], [0, 0, 1, 1], [], []>} : vector<16x4xf32>, vector<4x96xf32>, vector<16x96xf32> -> vector<16x96xf32>
    %299 = arith.negf %294 : vector<16x96xf32>
    %300 = math.exp %299 : vector<16x96xf32>
    %cst_195 = arith.constant 1.000000e+00 : f32
    %301 = vector.broadcast %cst_195 : f32 to vector<16x96xf32>
    %302 = arith.addf %301, %300 : vector<16x96xf32>
    %303 = arith.divf %301, %302 : vector<16x96xf32>
    %304 = arith.mulf %294, %303 : vector<16x96xf32>
    %305 = arith.mulf %304, %296 : vector<16x96xf32>
    %306 = arith.mulf %305, %298 : vector<16x96xf32>
    %c0_196 = arith.constant 0 : index
    %c0_197 = arith.constant 0 : index
    %307 = vector.load %arg8[%c0_196, %c0_197] : memref<96x32xf32, #tpu.memory_space<vmem>>, vector<96x32xf32>
    %cst_198 = arith.constant dense<0.000000e+00> : vector<16x32xf32>
    %308 = tpu.matmul %306, %307, %cst_198 {dimension_numbers = #tpu.dot_dimension_numbers<[1], [0], [0], [1], [0, 0, 1, 1], [], []>} : vector<16x96xf32>, vector<96x32xf32>, vector<16x32xf32> -> vector<16x32xf32>
    %309 = arith.addf %251, %308 : vector<16x32xf32>
    %c0_199 = arith.constant 0 : index
    %c0_200 = arith.constant 0 : index
    %310 = vector.load %arg16[%c0_199, %c0_200] : memref<16x32xf32, #tpu.memory_space<vmem>>, vector<16x32xf32>
    tpu.vector_store %arg16[%c0_199, %c0_200], %309 {strides = array<i32>} : memref<16x32xf32, #tpu.memory_space<vmem>>, vector<16x32xf32>,
    %cst_201 = arith.constant dense<0.000000e+00> : vector<4xf32>
    %311 = vector.multi_reduction <add>, %282, %cst_201 [0] : vector<16x4xf32> to vector<4xf32>
    %312 = vector.shape_cast %311 : vector<4xf32> to vector<1x4xf32>
    %cst_202 = arith.constant 1.600000e+01 : f32
    %313 = vector.broadcast %cst_202 : f32 to vector<1x4xf32>
    %314 = arith.divf %312, %313 : vector<1x4xf32>
    %cst_203 = arith.constant dense<0.000000e+00> : vector<4xf32>
    %315 = vector.multi_reduction <add>, %275, %cst_203 [0] : vector<16x4xf32> to vector<4xf32>
    %316 = vector.shape_cast %315 : vector<4xf32> to vector<1x4xf32>
    %cst_204 = arith.constant 1.600000e+01 : f32
    %317 = vector.broadcast %cst_204 : f32 to vector<1x4xf32>
    %318 = arith.divf %316, %317 : vector<1x4xf32>
    %319 = arith.mulf %314, %318 : vector<1x4xf32>
    %cst_205 = arith.constant dense<0.000000e+00> : vector<1xf32>
    %320 = vector.multi_reduction <add>, %319, %cst_205 [1] : vector<1x4xf32> to vector<1xf32>
    %321 = vector.shape_cast %320 : vector<1xf32> to vector<1x1xf32>
    %cst_206 = arith.constant 4.000000e-02 : f32
    %322 = vector.broadcast %cst_206 : f32 to vector<1x1xf32>
    %323 = arith.mulf %322, %321 : vector<1x1xf32>
    %c0_207 = arith.constant 0 : index
    %c0_208 = arith.constant 0 : index
    %324 = vector.load %arg17[%c0_207, %c0_208] : memref<1x1xf32, #tpu.memory_space<vmem>>, vector<1x1xf32>
    tpu.vector_store %arg17[%c0_207, %c0_208], %323 {strides = array<i32>} : memref<1x1xf32, #tpu.memory_space<vmem>>, vector<1x1xf32>,
    return
  }
}

</mosaic_0001>

<bundles_post_ra>
// kernel: block_forward.1
= control target key start
LH: loop header
LB: loop body
LE: loop exit
PB: predicated region body
PF: predicated region fallthrough
CT: control target
= control target key end

     0   :  { %s4382_s0 = inlined_call_operand.vmem [shape: f32[16,32], index: 0, kind: input, shape index: {}]   ;;  %s4383_s1 = inlined_call_operand.vmem [shape: f32[1,32], index: 1, kind: input, shape index: {}]   ;;  %s4384_s2 = inlined_call_operand.hbm [shape: f32[1,32], index: 2, kind: input, shape index: {}]   ;;  %s4385_s3 = inlined_call_operand.vmem [shape: f32[32,64], index: 3, kind: input, shape index: {}]   ;;  %s4386_s4 = inlined_call_operand.vmem [shape: f32[32,32], index: 4, kind: input, shape index: {}]   ;;  %s4387_s5 = inlined_call_operand.vmem [shape: f32[32,4], index: 5, kind: input, shape index: {}]   ;;  %s4388_s6 = inlined_call_operand.vmem [shape: f32[32,96], index: 6, kind: input, shape index: {}]   ;;  %s4389_s7 = inlined_call_operand.vmem [shape: f32[32,96], index: 7, kind: input, shape index: {}]   ;;  %s4390_s8 = inlined_call_operand.vmem [shape: f32[96,32], index: 8, kind: input, shape index: {}]   ;;  %s4391_s9 = inlined_call_operand.hbm [shape: f32[4,96], index: 9, kind: input, shape index: {}]   ;;  %s4392_s10 = inlined_call_operand.hbm [shape: f32[16,32], index: 10, kind: input, shape index: {}]   ;;  %s4393_s11 = inlined_call_operand.hbm [shape: f32[16,32], index: 11, kind: input, shape index: {}]   ;;  %s4394_s12 = inlined_call_operand.hbm [shape: f32[16,16], index: 12, kind: input, shape index: {}]   ;;  %s4395_s13 = inlined_call_operand.hbm [shape: f32[16,16], index: 13, kind: input, shape index: {}]   ;;  %s4396_s14 = inlined_call_operand.vmem [shape: f32[32,32], index: 14, kind: input, shape index: {}]   ;;  %s4397_s15 = inlined_call_operand.hbm [shape: f32[16,16], index: 15, kind: input, shape index: {}]   ;;  %s4398_s16 = inlined_call_operand.hbm [shape: f32[16,32], index: 16, kind: output, shape index: {0}]   ;;  %s4399_s17 = inlined_call_operand.hbm [shape: f32[1,1], index: 17, kind: output, shape index: {1}]  }
   0x1   :  { %4401 = sst [smem:[#allocation27_spill]] %s4382_s0 }
   0x2   :  { %4402 = sst [smem:[#allocation28_spill]] %s4383_s1 }
   0x3   :  { %23 = vsyncpa [#allocation7], 0 }
   0x4   :  { %24 = vsyncpa [#allocation10], 0 }
   0x5   :  { %25 = vsyncpa [#allocation13], 0 }
   0x6   :  { %26 = vsyncpa [#allocation16], 0 }
   0x7   :  { %27 = vsyncpa [#allocation8], 0 }
   0x8   :  { %28 = vsyncpa [#allocation20], 0  ;;  %s3731_s24 = smov [#allocation9]   ;;  %s3521_s28 = scalar_lea.hbm %s4391_s9, 64 }
   0x9   :  { %s61_s25 = sshll.u32 %s3731_s24, 4  ;;  %p3522_p0 = scmp.ne.s32.totalorder %s4391_s9, %s3521_s28  ;;  %s62_s25 = int_to_ptr.vmem [resolvable:$true] %s61_s25 }
   0xa   :  { %p3525_p1 = scmp.lt.u32.totalorder %s3521_s28, %s4391_s9 }
   0xc   :  { %p3527_p2 = pnand %p3525_p1, %p3522_p0 }
   0xe   :  { %3530 = shalt.err (!%p3527_p2)
}
   0xf   :  { %s3531_s19 = scalar_lea.vmem %s62_s25, 64  ;;  %p3536_p4 = scmp.lt.s32.totalorder %s62_s25, %s62_s25 }
  0x10   :  { %p3532_p3 = scmp.ne.s32.totalorder %s62_s25, %s3531_s19  ;;  %p3537_p5 = scmp.lt.s32.totalorder %s3531_s19, %s3531_s19 }
  0x12   :  { %p3538_p6 = por %p3537_p5, %p3536_p4 }
  0x14   :  { %p3539_p7 = pnand %p3538_p6, %p3532_p3 }
  0x16   :  { %3542 = shalt.err (!%p3539_p7)
}
  0x17   :  { %64 = dma.hbm_to_vmem [thread:$0]  %s4391_s9, 64, %s62_s25, [#allocation10]  }
  0x18   :  { %s3732_s21 = smov [#allocation12]   ;;  %s3733_s23 = smov [#allocation15]  }
  0x19   :  { %s82_s22 = sshll.u32 %s3732_s21, 4  ;;  %s106_s24 = sshll.u32 %s3733_s23, 4  ;;  %s83_s22 = int_to_ptr.vmem [resolvable:$true] %s82_s22  ;;  %s107_s24 = int_to_ptr.vmem [resolvable:$true] %s106_s24 }
  0x1a   :  { %s3543_s28 = scalar_lea.hbm %s4393_s11, 256 }
  0x1b   :  { %p3544_p8 = scmp.ne.s32.totalorder %s4393_s11, %s3543_s28  ;;  %p3547_p9 = scmp.lt.u32.totalorder %s3543_s28, %s4393_s11 }
  0x1d   :  { %p3549_p10 = pnand %p3547_p9, %p3544_p8 }
  0x1f   :  { %3552 = shalt.err (!%p3549_p10)
}
  0x20   :  { %s3553_s9 = scalar_lea.vmem %s83_s22, 256  ;;  %p3558_p12 = scmp.lt.s32.totalorder %s83_s22, %s83_s22 }
  0x21   :  { %p3554_p11 = scmp.ne.s32.totalorder %s83_s22, %s3553_s9  ;;  %p3559_p13 = scmp.lt.s32.totalorder %s3553_s9, %s3553_s9 }
  0x23   :  { %p3560_p0 = por %p3559_p13, %p3558_p12 }
  0x25   :  { %p3561_p1 = pnand %p3560_p0, %p3554_p11 }
  0x27   :  { %3564 = shalt.err (!%p3561_p1)
}
  0x28   :  { %s3734_s25 = smov 128   ;;  %s3735_s19 = smov 8  }
  0x29   :  { %88 = dma.hbm_to_vmem [thread:$0]  %s4393_s11, 256, %s83_s22, [#allocation13], %s3734_s25, %s3734_s25, %s3735_s19  }
  0x2a   :  { %s3565_s26 = scalar_lea.hbm %s4395_s13, 256 }
  0x2b   :  { %p3566_p2 = scmp.ne.s32.totalorder %s4395_s13, %s3565_s26  ;;  %p3569_p3 = scmp.lt.u32.totalorder %s3565_s26, %s4395_s13 }
  0x2d   :  { %p3571_p4 = pnand %p3569_p3, %p3566_p2 }
  0x2f   :  { %3574 = shalt.err (!%p3571_p4)
}
  0x30   :  { %s3575_s30 = scalar_lea.vmem %s107_s24, 256  ;;  %p3580_p6 = scmp.lt.s32.totalorder %s107_s24, %s107_s24 }
  0x31   :  { %p3576_p5 = scmp.ne.s32.totalorder %s107_s24, %s3575_s30  ;;  %p3581_p7 = scmp.lt.s32.totalorder %s3575_s30, %s3575_s30 }
  0x33   :  { %p3582_p8 = por %p3581_p7, %p3580_p6 }
  0x35   :  { %p3583_p9 = pnand %p3582_p8, %p3576_p5 }
  0x37   :  { %3586 = shalt.err (!%p3583_p9)
}
  0x38   :  { %112 = dma.hbm_to_vmem [thread:$0]  %s4395_s13, 256, %s107_s24, [#allocation16], %s3734_s25, %s3734_s25, %s3735_s19  }
  0x39   :  { %s3736_s18 = smov [#allocation6]   ;;  %s3737_s1 = smov [#allocation11]  }
  0x3a   :  { %s39_s9 = sshll.u32 %s3736_s18, 4  ;;  %s70_s20 = sshll.u32 %s3737_s1, 4  ;;  %s40_s9 = int_to_ptr.vmem [resolvable:$true] %s39_s9  ;;  %s71_s20 = int_to_ptr.vmem [resolvable:$true] %s70_s20 }
  0x3b   :  { %s3587_s26 = scalar_lea.hbm %s4384_s2, 16 }
  0x3c   :  { %p3588_p10 = scmp.ne.s32.totalorder %s4384_s2, %s3587_s26  ;;  %p3591_p11 = scmp.lt.u32.totalorder %s3587_s26, %s4384_s2 }
  0x3e   :  { %p3593_p12 = pnand %p3591_p11, %p3588_p10 }
  0x40   :  { %3596 = shalt.err (!%p3593_p12)
}
  0x41   :  { %s3597_s13 = scalar_lea.vmem %s40_s9, 16  ;;  %s3601_s24 = scalar_lea.vmem %s40_s9, 32 }
  0x42   :  { %p3598_p13 = scmp.ne.s32.totalorder %s40_s9, %s3597_s13  ;;  %p3602_p0 = scmp.lt.s32.totalorder %s40_s9, %s40_s9 }
  0x43   :  { %p3603_p1 = scmp.lt.s32.totalorder %s3601_s24, %s3597_s13 }
  0x45   :  { %p3604_p2 = por %p3603_p1, %p3602_p0 }
  0x47   :  { %p3605_p3 = pnand %p3604_p2, %p3598_p13 }
  0x49   :  { %3608 = shalt.err (!%p3605_p3)
}
  0x4a   :  { %42 = dma.hbm_to_vmem [thread:$0]  %s4384_s2, 16, %s40_s9, [#allocation7]  }
  0x4b   :  { %s3609_s1 = scalar_lea.hbm %s4392_s10, 256 }
  0x4c   :  { %p3610_p4 = scmp.ne.s32.totalorder %s4392_s10, %s3609_s1  ;;  %p3613_p5 = scmp.lt.u32.totalorder %s3609_s1, %s4392_s10 }
  0x4e   :  { %p3615_p6 = pnand %p3613_p5, %p3610_p4 }
  0x50   :  { %3618 = shalt.err (!%p3615_p6)
}
  0x51   :  { %s3619_s28 = scalar_lea.vmem %s71_s20, 256  ;;  %p3624_p8 = scmp.lt.s32.totalorder %s71_s20, %s71_s20 }
  0x52   :  { %p3620_p7 = scmp.ne.s32.totalorder %s71_s20, %s3619_s28  ;;  %p3625_p9 = scmp.lt.s32.totalorder %s3619_s28, %s3619_s28 }
  0x54   :  { %p3626_p10 = por %p3625_p9, %p3624_p8 }
  0x56   :  { %p3627_p11 = pnand %p3626_p10, %p3620_p7 }
  0x58   :  { %3630 = shalt.err (!%p3627_p11)
}
  0x59   :  { %76 = dma.hbm_to_vmem [thread:$0]  %s4392_s10, 256, %s71_s20, [#allocation10], %s3734_s25, %s3734_s25, %s3735_s19  }
  0x5a   :  { %s3738_s29 = smov [#allocation14]   ;;  %s3739_s13 = smov [#allocation17]  }
  0x5b   :  { %s94_s0 = sshll.u32 %s3738_s29, 4  ;;  %s120_s24 = sshll.u32 %s3739_s13, 4  ;;  %s95_s0 = int_to_ptr.vmem [resolvable:$true] %s94_s0  ;;  %s121_s24 = int_to_ptr.vmem [resolvable:$true] %s120_s24 }
  0x5c   :  { %s3631_s22 = scalar_lea.hbm %s4394_s12, 256 }
  0x5d   :  { %p3632_p12 = scmp.ne.s32.totalorder %s4394_s12, %s3631_s22  ;;  %p3635_p13 = scmp.lt.u32.totalorder %s3631_s22, %s4394_s12 }
  0x5f   :  { %p3637_p0 = pnand %p3635_p13, %p3632_p12 }
  0x61   :  { %3640 = shalt.err (!%p3637_p0)
}
  0x62   :  { %s3641_s10 = scalar_lea.vmem %s95_s0, 256  ;;  %p3646_p2 = scmp.lt.s32.totalorder %s95_s0, %s95_s0 }
  0x63   :  { %p3642_p1 = scmp.ne.s32.totalorder %s95_s0, %s3641_s10  ;;  %p3647_p3 = scmp.lt.s32.totalorder %s3641_s10, %s3641_s10 }
  0x65   :  { %p3648_p4 = por %p3647_p3, %p3646_p2 }
  0x67   :  { %p3649_p5 = pnand %p3648_p4, %p3642_p1 }
  0x69   :  { %3652 = shalt.err (!%p3649_p5)
}
  0x6a   :  { %100 = dma.hbm_to_vmem [thread:$0]  %s4394_s12, 256, %s95_s0, [#allocation13], %s3734_s25, %s3734_s25, %s3735_s19  }
  0x6b   :  { %s3653_s2 = scalar_lea.hbm %s4397_s15, 256 }
  0x6c   :  { %p3654_p6 = scmp.ne.s32.totalorder %s4397_s15, %s3653_s2  ;;  %p3657_p7 = scmp.lt.u32.totalorder %s3653_s2, %s4397_s15 }
  0x6e   :  { %p3659_p8 = pnand %p3657_p7, %p3654_p6 }
  0x70   :  { %3662 = shalt.err (!%p3659_p8)
}
  0x71   :  { %s3663_s11 = scalar_lea.vmem %s121_s24, 256  ;;  %p3668_p10 = scmp.lt.s32.totalorder %s121_s24, %s121_s24 }
  0x72   :  { %p3664_p9 = scmp.ne.s32.totalorder %s121_s24, %s3663_s11  ;;  %p3669_p11 = scmp.lt.s32.totalorder %s3663_s11, %s3663_s11 }
  0x74   :  { %p3670_p12 = por %p3669_p11, %p3668_p10 }
  0x76   :  { %p3671_p13 = pnand %p3670_p12, %p3664_p9 }
  0x78   :  { %3674 = shalt.err (!%p3671_p13)
}
  0x79   :  { %126 = dma.hbm_to_vmem [thread:$0]  %s4397_s15, 256, %s121_s24, [#allocation16], %s3734_s25, %s3734_s25, %s3735_s19  }
  0x7a   :  { %3719 = dma.done.wait [#allocation7], 16  }
  0x7b   :  { %3720 = vsyncadd [#allocation7], 4294967280 }
  0x7c   :  { %3721 = dma.done.wait [#allocation10], 320  }
  0x7d   :  { %3722 = vsyncadd [#allocation10], 4294966976 }
  0x7e   :  { %3723 = dma.done.wait [#allocation13], 512  }
  0x7f   :  { %3724 = vsyncadd [#allocation13], 4294966784 }
  0x80   :  { %3725 = dma.done.wait [#allocation16], 512  }
  0x81   :  { %3726 = vsyncadd [#allocation16], 4294966784  ;;  %s4403_s1 = sld [smem:[#allocation27_spill]]  ;;  %vm152_vm0 = vcmask 261120   ;;  %v177_v6 = vld [vmem:[%s4385_s3] sm:$0xff]  ;;  %v178_v7 = vld [vmem:[%s4385_s3 + $0x8] sm:$0xff] }
  0x82   :  { %v179_v8 = vld [vmem:[%s4385_s3 + $0x10] sm:$0xff]  ;;  %v3365_v9 = vpack.c.bf16 %v178_v7, %v177_v6  ;;  %v180_v10 = vld [vmem:[%s4385_s3 + $0x18] sm:$0xff]  ;;  %v450_v12 = vld [vmem:[#allocation14] sm:$0xff]  ;;  %s3740_s9 = smov 32   ;;  %s4404_s13 = sld [smem:[#allocation28_spill]]  ;;  %vm262_vm1 = vcmask 523264  }
  0x83   :  { %v3369_v11 = vpack.c.bf16 %v180_v10, %v179_v8  ;;  %v267_v26 = vld [vmem:[%s4396_s14] sm:$0xff]  ;;  %v268_v27 = vld [vmem:[%s4396_s14 + $0x8] sm:$0xff]  ;;  %v269_v29 = vld [vmem:[%s4396_s14 + $0x10] sm:$0xff]  ;;  %s3741_s23 = smov 96   ;;  %vm358_vm2 = vcmask 130048   ;;  %v3742_v57 = vmov 0.0  }
  0x84   :  { %3366 = vmatprep.subr.bf16.mxu1 %v3365_v9  ;;  %v3373_v28 = vpack.c.bf16 %v268_v27, %v267_v26  ;;  %v270_v30 = vld [vmem:[%s4396_s14 + $0x18] sm:$0xff]  ;;  %v352_v32 = vld [vmem:[#allocation17] sm:$0xff]  ;;  %v353_v33 = vld [vmem:[#allocation17 + $0x8] sm:$0xff]  ;;  %3185 = vmatprep.subr.mxu0 %v3742_v57  ;;  %vm3743_vm3 = vmmov 0   ;;  %s3744_s14 = smov 120   ;;  %vm494_vm4 = vcmask 64512  }
  0x85   :  { %3368 = vmatpush3.bf16.msra.mxu1 %v3365_v9  ;;  %v3377_v31 = vpack.c.bf16 %v270_v30, %v269_v29  ;;  %v3381_v34 = vpack.c.bf16 %v353_v33, %v352_v32  ;;  %v439_v41 = vld [vmem:[#allocation11 + $0x8] sm:$0xff]  ;;  %v443_v42 = vld [vmem:[#allocation12 + $0x8] sm:$0xff]  ;;  %v438_v43 = vld [vmem:[#allocation11] sm:$0xff]  ;;  %3187 = vmatprep.mubr.msk.f32.mxu0 %vm3743_vm3, %v3742_v57  ;;  %s3745_s15 = smov 80   ;;  %s3746_s24 = smov 112   ;;  %vm2532_vm14 = vcmask 31744  }
  0x86   :  { %3370 = vmatprep.subr.bf16.mxu1 %v3369_v11  ;;  %v442_v44 = vld [vmem:[#allocation12] sm:$0xff]  ;;  %s3747_s28 = smov 72   ;;  %s3748_s2 = smov 104  }
  0x87   :  { %v3943_v0 = vld [vmem:[%s4403_s1] sm:$0xff]  ;;  %v3948_v1 = vld [vmem:[%s4403_s1 + $0x8] sm:$0xff]  ;;  %v462_v53 = vld [vmem:[#allocation15] sm:$0xff]  ;;  %s3749_s3 = smov [#allocation19]  }
  0x88   :  { %v150_v2 = vmul.f32 %v3943_v0, %v3943_v0  ;;  %v151_v3 = vmul.f32 %v3948_v1, %v3948_v1  ;;  %v2999_v20 = vld [vmem:[%s4404_s13] ss:$0 sm:$0xff]  ;;  %s2983_s13 = sshll.u32 %s3749_s3, 4  ;;  %s2984_s13 = int_to_ptr.vmem [resolvable:$true] %s2983_s13 }
  0x89   :  { %3372 = vmatpush3.bf16.msra.mxu1 %v3369_v11  ;;  %s3679_s30 = scalar_lea.vmem %s2984_s13, 32  ;;  %p3680_p1 = scmp.lt.s32.totalorder %s2984_s13, %s2984_s13 }
  0x8a   :  { %v153_v4 = vsel %vm152_vm0, %v150_v2, 0.0  ;;  %v156_v5 = vsel %vm152_vm0, %v151_v3, 0.0  ;;  %3374 = vmatprep.subr.bf16.mxu1 %v3373_v28 }
  0x8b   :  { %154 = vadd.xlane.f32.xlu0 %v153_v4  ;;  %v486_v4 = vlaneseq }
  0x8d   :  { %v489_v6 = vand.u32 127, %v486_v4 }
  0x8f   :  { %157 = vadd.xlane.f32.xlu0 %v156_v5  ;;  %v487_v5 = vshrl.u32 %v486_v4, 7 }
  0x91   :  { %vm4033_vm5 = vcmp.ge.s32.totalorder %v487_v5, %v489_v6 }
  0xa5   :  { %454 = vrot.lane.b32.xlu0 %v450_v12, %s3740_s9 }
 0x118   :  { %v155_v13 = vpop.xlane.xlu0 %154 }
 0x119   :  { %v160_v14 = vmul.f32 0.03125, %v155_v13 }
 0x11b   :  { %v163_v15 = vadd.f32 1e-06, %v160_v14 }
 0x11c   :  { %v158_v16 = vpop.xlane.xlu0 %157 }
 0x11d   :  { %3465 = vrsqrt.f32 %v163_v15  ;;  %v161_v17 = vmul.f32 0.03125, %v158_v16 }
 0x11f   :  { %v164_v18 = vadd.f32 1e-06, %v161_v17 }
 0x120   :  { %v455_v58 = vpop.permute.xlu0 %454 }
 0x121   :  { %3467 = vrsqrt.f32 %v164_v18 }
 0x127   :  { %v3466_v19 = vpop.eup %3465 }
 0x128   :  { %v167_v21 = vmul.f32 %v3466_v19, %v3943_v0 }
 0x12a   :  { %v175_v22 = vmul.f32 %v2999_v20, %v167_v21 }
 0x12b   :  { %v3468_v23 = vpop.eup %3467 }
 0x12c   :  { %v168_v24 = vmul.f32 %v3468_v23, %v3948_v1  ;;  %3159 = vmatprep.mubr.msk.f32.mxu1 %vm152_vm0, %v175_v22 }
 0x12e   :  { %v176_v25 = vmul.f32 %v2999_v20, %v168_v24 }
 0x130   :  { %3160 = vmatmul.mubr.msk.f32.vlgmr.msra.gmra.mrb[0].mxu1 %vm152_vm0, %v176_v25 }
 0x131   :  { %3376 = vmatpush3.bf16.msra.mxu1 %v3373_v28 }
 0x132   :  { %3378 = vmatprep.subr.bf16.mxu1 %v3377_v31 }
 0x135   :  { %3380 = vmatpush3.bf16.msra.mxu1 %v3377_v31 }
 0x136   :  { %3382 = vmatprep.subr.bf16.mxu1 %v3381_v34 }
 0x203   :  { %v3161_v35 = vpop.f32.mrb[0].mxu1 }
 0x204   :  { %264 = vst.msk [vmem:[#allocation2 + $0x8] sm:$0xff] %vm262_vm1, %v3161_v35  ;;  %v253_v36 = vpop.f32.mrb[1].mxu1 }
 0x205   :  { %263 = vst.msk [vmem:[#allocation2] sm:$0xff] %vm262_vm1, %v253_v36 }
 0x20b   :  { %v3994_v38 = vld [vmem:[#allocation2 + $0x8] sm:$0xff] }
 0x20c   :  { %v3988_v37 = vld [vmem:[#allocation2] sm:$0xff]  ;;  %v441_v46 = vmul.f32 %v439_v41, %v3994_v38  ;;  %v4069_v41 = vld [vmem:[%s4386_s4 + $0x8] sm:$0xff] }
 0x20d   :  { %354 = vrot.lane.b32.xlu1 %v3988_v37, %s3741_s23  ;;  %3170 = vmatprep.mubr.msk.f32.mxu1 %vm152_vm0, %v3988_v37  ;;  %v440_v49 = vmul.f32 %v438_v43, %v3988_v37  ;;  %v460_v59 = vmul.f32 %v455_v58, %v3988_v37 }
 0x20e   :  { %3171 = vmatmul.mubr.msk.f32.vlgmr.msra.gmra.mrb[2].mxu1 %vm152_vm0, %v3994_v38 }
 0x20f   :  { %3384 = vmatpush3.bf16.msra.mxu1 %v3381_v34 }
 0x210   :  { %3180 = vmatprep.subr.mxu1 %v3742_v57 }
 0x211   :  { %356 = vrot.lane.b32.xlu1 %v3994_v38, %s3741_s23 }
 0x27f   :  { %v355_v39 = vpop.permute.xlu1 %354 }
 0x280   :  { %3177 = vmatprep.mubr.msk.f32.mxu1 %vm358_vm2, %v355_v39 }
 0x283   :  { %v357_v40 = vpop.permute.xlu1 %356 }
 0x284   :  { %3178 = vmatmul.mubr.msk.f32.vlgmr.msra.gmra.mrb[4].mxu1 %vm358_vm2, %v357_v40 }
 0x285   :  { %3182 = vmatprep.mubr.msk.f32.mxu1 %vm3743_vm3, %v3742_v57 }
 0x2e1   :  { %v3172_v45 = vpop.f32.mrb[2].mxu1 }
 0x2e2   :  { %v445_v47 = vmul.f32 %v3172_v45, %v443_v42  ;;  %v343_v48 = vpop.f32.mrb[3].mxu1 }
 0x2e3   :  { %v444_v50 = vmul.f32 %v442_v44, %v343_v48  ;;  %v4076_v44 = vld [vmem:[%s4386_s4] sm:$0xff] }
 0x2e4   :  { %v447_v51 = vadd.f32 %v445_v47, %v441_v46 }
 0x2e5   :  { %v446_v52 = vadd.f32 %v444_v50, %v440_v49 }
 0x2e6   :  { %449 = vst.msk [vmem:[#allocation3 + $0x8] sm:$0xff] %vm152_vm0, %v447_v51 }
 0x2e7   :  { %448 = vst.msk [vmem:[#allocation3] sm:$0xff] %vm152_vm0, %v446_v52 }
 0x2ee   :  { %v4017_v62 = vld [vmem:[#allocation3] sm:$0xff] }
 0x357   :  { %v4006_v54 = vpop.f32.mrb[4].mxu1 }
 0x358   :  { %v429_v55 = vpop.f32.mrb[5].mxu1 }
 0x359   :  { %v464_v56 = vmul.f32 %v462_v53, %v429_v55 }
 0x35b   :  { %468 = vrot.lane.b32.xlu1 %v464_v56, %s3740_s9 }
 0x3cd   :  { %v469_v60 = vpop.permute.xlu1 %468 }
 0x3ce   :  { %v474_v61 = vadd.f32 %v469_v60, %v460_v59 }
 0x3d0   :  { %478 = vrot.lane.b32.xlu1 %v474_v61, %s3741_s23 }
 0x3d4   :  { %664 = vrot.lane.b32.xlu1 %v4017_v62, %s3744_s14 }
 0x442   :  { %v479_v63 = vpop.permute.xlu1 %478 }
 0x443   :  { %484 = vst.msk [vmem:[#allocation4] sm:$0xff] %vm358_vm2, %v479_v63 }
 0x446   :  { %v665_v3 = vpop.permute.xlu1 %664 }
 0x44a   :  { %v492_v2 = vld [vmem:[#allocation4] sm:$0xff] }
 0x44b   :  { %3181 = vmatpush3.xpose.msk.msra.mxu1 %vm494_vm4, %v492_v2 }
 0x44c   :  { %3190 = vmatprep.subr.mxu1 %v3742_v57 }
 0x44e   :  { %3183 = vmatmul.mubr.msk.f32.vlgmr.msra.gmra.mrb[6].mxu1 %vm494_vm4, %v4017_v62 }
 0x44f   :  { %3191 = vmatpush3.xpose.msk.msra.mxu1 %vm494_vm4, %v492_v2  ;;  %3192 = vmatprep.mubr.msk.f32.mxu1 %vm3743_vm3, %v3742_v57 }
 0x450   :  { %3200 = vmatprep.subr.mxu1 %v3742_v57 }
 0x452   :  { %3193 = vmatmul.mubr.msk.f32.vlgmr.msra.gmra.mrb[8].mxu1 %vm494_vm4, %v665_v3 }
 0x453   :  { %3202 = vmatprep.mubr.msk.f32.mxu1 %vm3743_vm3, %v3742_v57  ;;  %3201 = vmatpush3.msra.mxu1 %v4069_v41 }
 0x454   :  { %3205 = vmatprep.subr.mxu1 %v3742_v57 }
 0x521   :  { %v567_v7 = vpop.f32.mrb[6].mxu1 }
 0x522   :  { %v571_v9 = vmul.f32 0.35355338, %v567_v7  ;;  %v3184_v10 = vpop.f32.mrb[7].mxu1 }
 0x524   :  { %v572_v11 = vsel %vm4033_vm5, %v571_v9, 0.0 }
 0x525   :  { %v734_v12 = vpop.f32.mrb[8].mxu1  ;;  %vm573_vm6 = vcmp.eq.f32.partialorder %v572_v11, 0.0 }
 0x526   :  { %v738_v13 = vmul.f32 0.35355338, %v734_v12  ;;  %v3194_v14 = vpop.f32.mrb[9].mxu1  ;;  %v574_v15 = vsel %vm573_vm6, -inf, %v572_v11  ;;  %v451_v12 = vld [vmem:[#allocation14 + $0x8] sm:$0xff]  ;;  %vm2851_vm6 = vcmask 785408  }
 0x527   :  { %v575_v16 = vsel %vm494_vm4, %v574_v15, -inf }
 0x528   :  { %576 = vmax.xlane.f32.xlu1 %v575_v16  ;;  %v739_v17 = vsel %vm4033_vm5, %v738_v13, 0.0 }
 0x529   :  { %vm740_vm7 = vcmp.eq.f32.partialorder %v739_v17, 0.0 }
 0x52a   :  { %v741_v18 = vsel %vm740_vm7, -inf, %v739_v17 }
 0x52b   :  { %v742_v19 = vsel %vm494_vm4, %v741_v18, -inf }
 0x52c   :  { %743 = vmax.xlane.f32.xlu0 %v742_v19 }
 0x539   :  { %975 = vrot.lane.b32.xlu1 %v492_v2, %s3744_s14 }
 0x542   :  { %587 = vrot.lane.b32.xlu0 %v3988_v37, %s3745_s15 }
 0x5b5   :  { %v577_v20 = vpop.xlane.xlu1 %576 }
 0x5b6   :  { %v578_v21 = vsub.f32 %v574_v15, %v577_v20  ;;  %v4122_v20 = vld [vmem:[#allocation3 + $0x8] sm:$0xff] }
 0x5b8   :  { %v579_v22 = vmul.f32 1.442695, %v578_v21 }
 0x5b9   :  { %v744_v23 = vpop.xlane.xlu0 %743  ;;  %v4051_v31 = vpop.permute.xlu1 %975 }
 0x5ba   :  { %3469 = vpow2.f32 %v579_v22  ;;  %v745_v24 = vsub.f32 %v741_v18, %v744_v23  ;;  %v463_v18 = vld [vmem:[#allocation15 + $0x8] sm:$0xff] }
 0x5bb   :  { %v465_v19 = vmul.f32 %v4006_v54, %v463_v18  ;;  %v4131_v54 = vld [vmem:[%s4386_s4 + $0x18] sm:$0xff] }
 0x5bc   :  { %v746_v25 = vmul.f32 1.442695, %v745_v24 }
 0x5bd   :  { %v588_v26 = vpop.permute.xlu0 %587 }
 0x5be   :  { %3471 = vpow2.f32 %v746_v25  ;;  %3186 = vmatpush3.msra.mxu0 %v588_v26 }
 0x5bf   :  { %3195 = vmatprep.subr.mxu0 %v3742_v57 }
 0x5c4   :  { %v3470_v27 = vpop.eup %3469 }
 0x5c5   :  { %v581_v28 = vsel %vm494_vm4, %v3470_v27, 0.0 }
 0x5c6   :  { %582 = vadd.xlane.f32.xlu1 %v581_v28 }
 0x5c8   :  { %v3472_v29 = vpop.eup %3471 }
 0x5c9   :  { %v748_v30 = vsel %vm494_vm4, %v3472_v29, 0.0 }
 0x5ca   :  { %749 = vadd.xlane.f32.xlu1 %v748_v30 }
 0x5db   :  { %973 = vrot.lane.b32.xlu1 %v4017_v62, %s3746_s24 }
 0x653   :  { %v583_v32 = vpop.xlane.xlu1 %582 }
 0x654   :  { %3473 = vrcp.f32 %v583_v32 }
 0x657   :  { %v750_v33 = vpop.xlane.xlu1 %749 }
 0x658   :  { %3475 = vrcp.f32 %v750_v33 }
 0x65b   :  { %v974_v40 = vpop.permute.xlu1 %973 }
 0x65e   :  { %v3474_v34 = vpop.eup %3473 }
 0x65f   :  { %v585_v35 = vmul.f32 %v3474_v34, %v3470_v27 }
 0x661   :  { %3188 = vmatmul.mubr.msk.f32.vlgmr.msra.gmra.mrb[0].mxu0 %vm494_vm4, %v585_v35 }
 0x662   :  { %v3476_v36 = vpop.eup %3475  ;;  %3196 = vmatpush3.msra.mxu0 %v588_v26  ;;  %3197 = vmatprep.mubr.msk.f32.mxu0 %vm3743_vm3, %v3742_v57 }
 0x663   :  { %v752_v39 = vmul.f32 %v3476_v36, %v3472_v29  ;;  %3210 = vmatprep.subr.mxu0 %v3742_v57 }
 0x665   :  { %3198 = vmatmul.mubr.msk.f32.vlgmr.msra.gmra.mrb[2].mxu0 %vm494_vm4, %v752_v39 }
 0x666   :  { %3212 = vmatprep.mubr.msk.f32.mxu0 %vm3743_vm3, %v3742_v57 }
 0x669   :  { %3211 = vmatpush3.xpose.msk.msra.mxu0 %vm494_vm4, %v4051_v31 }
 0x66a   :  { %3215 = vmatprep.subr.mxu0 %v3742_v57 }
 0x66c   :  { %3213 = vmatmul.mubr.msk.f32.vlgmr.msra.gmra.mrb[4].mxu0 %vm494_vm4, %v974_v40 }
 0x66d   :  { %3217 = vmatprep.mubr.msk.f32.mxu0 %vm3743_vm3, %v3742_v57 }
 0x734   :  { %v659_v42 = vpop.f32.mrb[0].mxu0 }
 0x735   :  { %v3189_v43 = vpop.f32.mrb[1].mxu0 }
 0x738   :  { %v822_v45 = vpop.f32.mrb[2].mxu0 }
 0x739   :  { %v3199_v46 = vpop.f32.mrb[3].mxu0  ;;  %3203 = vmatmul.mubr.msk.f32.vlgmr.msra.gmra.mrb[10].mxu1 %vm494_vm4, %v822_v45 }
 0x73a   :  { %3206 = vmatpush3.msra.mxu1 %v4076_v44  ;;  %3207 = vmatprep.mubr.msk.f32.mxu1 %vm3743_vm3, %v3742_v57 }
 0x73b   :  { %3220 = vmatprep.subr.mxu1 %v3742_v57 }
 0x73f   :  { %v1047_v47 = vpop.f32.mrb[4].mxu0 }
 0x740   :  { %v1051_v48 = vmul.f32 0.35355338, %v1047_v47  ;;  %v3214_v49 = vpop.f32.mrb[5].mxu0 }
 0x741   :  { %3208 = vmatmul.mubr.msk.f32.vlgmr.msra.gmra.mrb[10].mxu1 %vm494_vm4, %v659_v42 }
 0x742   :  { %v1052_v50 = vsel %vm4033_vm5, %v1051_v48, 0.0  ;;  %3222 = vmatprep.mubr.msk.f32.mxu1 %vm3743_vm3, %v3742_v57 }
 0x743   :  { %vm1053_vm8 = vcmp.eq.f32.partialorder %v1052_v50, 0.0 }
 0x744   :  { %v1054_v51 = vsel %vm1053_vm8, -inf, %v1052_v50 }
 0x745   :  { %v1055_v52 = vsel %vm494_vm4, %v1054_v51, -inf }
 0x746   :  { %1056 = vmax.xlane.f32.xlu0 %v1055_v52 }
 0x75c   :  { %1066 = vrot.lane.b32.xlu0 %v3988_v37, %s3747_s28  ;;  %v4098_v37 = vld [vmem:[%s4386_s4 + $0x10] sm:$0xff] }
 0x75d   :  { %3221 = vmatpush3.msra.mxu1 %v4098_v37 }
 0x75e   :  { %3230 = vmatprep.subr.mxu1 %v3742_v57 }
 0x7d3   :  { %v1057_v53 = vpop.xlane.xlu0 %1056 }
 0x7d4   :  { %v1058_v55 = vsub.f32 %v1054_v51, %v1057_v53 }
 0x7d6   :  { %v1059_v56 = vmul.f32 1.442695, %v1058_v55 }
 0x7d7   :  { %v1067_v58 = vpop.permute.xlu0 %1066 }
 0x7d8   :  { %3477 = vpow2.f32 %v1059_v56  ;;  %3216 = vmatpush3.msra.mxu0 %v1067_v58 }
 0x7d9   :  { %3225 = vmatprep.subr.mxu0 %v3742_v57 }
 0x7e2   :  { %v3478_v59 = vpop.eup %3477 }
 0x7e3   :  { %v1061_v60 = vsel %vm494_vm4, %v3478_v59, 0.0 }
 0x7e4   :  { %1062 = vadd.xlane.f32.xlu1 %v1061_v60 }
 0x7f5   :  { %1217 = vrot.lane.b32.xlu1 %v4017_v62, %s3748_s2 }
 0x871   :  { %v1063_v61 = vpop.xlane.xlu1 %1062 }
 0x872   :  { %3479 = vrcp.f32 %v1063_v61 }
 0x875   :  { %v1218_v62 = vpop.permute.xlu1 %1217 }
 0x87c   :  { %v3480_v63 = vpop.eup %3479 }
 0x87d   :  { %v1065_v2 = vmul.f32 %v3480_v63, %v3478_v59 }
 0x87f   :  { %3218 = vmatmul.mubr.msk.f32.vlgmr.msra.gmra.mrb[6].mxu0 %vm494_vm4, %v1065_v2 }
 0x880   :  { %3226 = vmatpush3.xpose.msk.msra.mxu0 %vm494_vm4, %v4051_v31  ;;  %3227 = vmatprep.mubr.msk.f32.mxu0 %vm3743_vm3, %v3742_v57 }
 0x881   :  { %3240 = vmatprep.subr.mxu0 %v3742_v57 }
 0x883   :  { %3228 = vmatmul.mubr.msk.f32.vlgmr.msra.gmra.mrb[8].mxu0 %vm494_vm4, %v1218_v62 }
 0x884   :  { %3242 = vmatprep.mubr.msk.f32.mxu0 %vm3743_vm3, %v3742_v57 }
 0x952   :  { %v1138_v3 = vpop.f32.mrb[6].mxu0 }
 0x953   :  { %v3219_v4 = vpop.f32.mrb[7].mxu0  ;;  %3223 = vmatmul.mubr.msk.f32.vlgmr.msra.gmra.mrb[10].mxu1 %vm494_vm4, %v1138_v3 }
 0x954   :  { %3231 = vmatpush3.msra.mxu1 %v1067_v58  ;;  %3232 = vmatprep.mubr.msk.f32.mxu1 %vm3743_vm3, %v3742_v57 }
 0x955   :  { %3235 = vmatprep.subr.mxu1 %v3742_v57 }
 0x956   :  { %v1287_v5 = vpop.f32.mrb[8].mxu0 }
 0x957   :  { %v1291_v6 = vmul.f32 0.35355338, %v1287_v5  ;;  %v3229_v7 = vpop.f32.mrb[9].mxu0 }
 0x959   :  { %v1292_v9 = vsel %vm4033_vm5, %v1291_v6, 0.0 }
 0x95a   :  { %vm1293_vm9 = vcmp.eq.f32.partialorder %v1292_v9, 0.0 }
 0x95b   :  { %v1294_v10 = vsel %vm1293_vm9, -inf, %v1292_v9 }
 0x95c   :  { %v1295_v11 = vsel %vm494_vm4, %v1294_v10, -inf }
 0x95d   :  { %1296 = vmax.xlane.f32.xlu0 %v1295_v11 }
 0x973   :  { %456 = vrot.lane.b32.xlu0 %v451_v12, %s3740_s9 }
 0x9ea   :  { %v1297_v13 = vpop.xlane.xlu0 %1296 }
 0x9eb   :  { %v1298_v14 = vsub.f32 %v1294_v10, %v1297_v13 }
 0x9ed   :  { %v1299_v15 = vmul.f32 1.442695, %v1298_v14 }
 0x9ee   :  { %v457_v21 = vpop.permute.xlu0 %456 }
 0x9ef   :  { %3481 = vpow2.f32 %v1299_v15  ;;  %v461_v23 = vmul.f32 %v457_v21, %v3994_v38 }
 0x9f9   :  { %v3482_v16 = vpop.eup %3481 }
 0x9fa   :  { %v1301_v17 = vsel %vm494_vm4, %v3482_v16, 0.0 }
 0x9fb   :  { %1302 = vadd.xlane.f32.xlu1 %v1301_v17 }
 0xa0c   :  { %470 = vrot.lane.b32.xlu1 %v465_v19, %s3740_s9 }
 0xa10   :  { %1627 = vrot.lane.b32.xlu1 %v4122_v20, %s3744_s14 }
 0xa88   :  { %v1303_v22 = vpop.xlane.xlu1 %1302 }
 0xa89   :  { %3483 = vrcp.f32 %v1303_v22 }
 0xa8c   :  { %v471_v24 = vpop.permute.xlu1 %470 }
 0xa8d   :  { %v475_v25 = vadd.f32 %v471_v24, %v461_v23 }
 0xa8f   :  { %480 = vrot.lane.b32.xlu0 %v475_v25, %s3741_s23 }
 0xa90   :  { %v1628_v32 = vpop.permute.xlu1 %1627 }
 0xa93   :  { %v3484_v26 = vpop.eup %3483 }
 0xa94   :  { %v1305_v27 = vmul.f32 %v3484_v26, %v3482_v16 }
 0xa96   :  { %3233 = vmatmul.mubr.msk.f32.vlgmr.msra.gmra.mrb[12].mxu1 %vm494_vm4, %v1305_v27 }
 0xa97   :  { %3236 = vmatpush3.msra.mxu1 %v4131_v54  ;;  %3237 = vmatprep.mubr.msk.f32.mxu1 %vm3743_vm3, %v3742_v57 }
 0xa98   :  { %3250 = vmatprep.subr.mxu1 %v3742_v57 }
 0xb01   :  { %v481_v28 = vpop.permute.xlu0 %480 }
 0xb02   :  { %485 = vst.msk [vmem:[#allocation4 + $0x8] sm:$0xff] %vm358_vm2, %v481_v28  ;;  %vm2742_vm2 = vcmask 1043456  }
 0xb09   :  { %v1456_v29 = vld [vmem:[#allocation4 + $0x8] sm:$0xff] }
 0xb0a   :  { %3241 = vmatpush3.xpose.msk.msra.mxu0 %vm494_vm4, %v1456_v29 }
 0xb0b   :  { %3245 = vmatprep.subr.mxu0 %v3742_v57 }
 0xb0d   :  { %3243 = vmatmul.mubr.msk.f32.vlgmr.msra.gmra.mrb[10].mxu0 %vm494_vm4, %v4122_v20 }
 0xb0e   :  { %3247 = vmatprep.mubr.msk.f32.mxu0 %vm3743_vm3, %v3742_v57 }
 0xb69   :  { %v1375_v30 = vpop.f32.mrb[12].mxu1 }
 0xb6a   :  { %v3234_v31 = vpop.f32.mrb[13].mxu1  ;;  %3238 = vmatmul.mubr.msk.f32.vlgmr.msra.gmra.mrb[10].mxu1 %vm494_vm4, %v1375_v30 }
 0xb6b   :  { %3251 = vmatpush3.xpose.msk.msra.mxu1 %vm494_vm4, %v1456_v29  ;;  %3252 = vmatprep.mubr.msk.f32.mxu1 %vm3743_vm3, %v3742_v57 }
 0xb6c   :  { %3260 = vmatprep.subr.mxu1 %v3742_v57 }
 0xb6e   :  { %3253 = vmatmul.mubr.msk.f32.vlgmr.msra.gmra.mrb[14].mxu1 %vm494_vm4, %v1628_v32 }
 0xb6f   :  { %3261 = vmatpush3.msra.mxu1 %v4069_v41  ;;  %3262 = vmatprep.mubr.msk.f32.mxu1 %vm3743_vm3, %v3742_v57 }
 0xb70   :  { %3265 = vmatprep.subr.mxu1 %v3742_v57 }
 0xbe0   :  { %v1530_v33 = vpop.f32.mrb[10].mxu0 }
 0xbe1   :  { %v1534_v34 = vmul.f32 0.35355338, %v1530_v33  ;;  %v3244_v35 = vpop.f32.mrb[11].mxu0 }
 0xbe3   :  { %v1535_v36 = vsel %vm4033_vm5, %v1534_v34, 0.0 }
 0xbe4   :  { %vm1536_vm10 = vcmp.eq.f32.partialorder %v1535_v36, 0.0 }
 0xbe5   :  { %v1537_v39 = vsel %vm1536_vm10, -inf, %v1535_v36 }
 0xbe6   :  { %v1538_v40 = vsel %vm494_vm4, %v1537_v39, -inf }
 0xbe7   :  { %1539 = vmax.xlane.f32.xlu0 %v1538_v40 }
 0xc3d   :  { %v1449_v42 = vpop.f32.mrb[10].mxu1 }
 0xc3e   :  { %1454 = vst.msk [vmem:[#allocation5] sm:$0xff] %vm152_vm0, %v1449_v42  ;;  %v3239_v41 = vpop.f32.mrb[11].mxu1 }
 0xc41   :  { %v1697_v43 = vpop.f32.mrb[14].mxu1 }
 0xc42   :  { %v1701_v45 = vmul.f32 0.35355338, %v1697_v43  ;;  %v3254_v46 = vpop.f32.mrb[15].mxu1 }
 0xc44   :  { %v1702_v47 = vsel %vm4033_vm5, %v1701_v45, 0.0 }
 0xc45   :  { %vm1703_vm11 = vcmp.eq.f32.partialorder %v1702_v47, 0.0  ;;  %v2418_v40 = vld [vmem:[#allocation5] sm:$0xff] }
 0xc46   :  { %v1704_v48 = vsel %vm1703_vm11, -inf, %v1702_v47  ;;  %v4214_v42 = vadd.f32 %v2418_v40, %v3943_v0 }
 0xc47   :  { %v1705_v49 = vsel %vm494_vm4, %v1704_v48, -inf }
 0xc48   :  { %1706 = vmax.xlane.f32.xlu1 %v1705_v49  ;;  %v2422_v8 = vmul.f32 %v4214_v42, %v4214_v42 }
 0xc4a   :  { %v2424_v45 = vsel %vm152_vm0, %v2422_v8, 0.0 }
 0xc59   :  { %1550 = vrot.lane.b32.xlu1 %v3994_v38, %s3745_s15 }
 0xc5d   :  { %1936 = vrot.lane.b32.xlu1 %v4122_v20, %s3746_s24 }
 0xc74   :  { %v1540_v50 = vpop.xlane.xlu0 %1539 }
 0xc75   :  { %v1541_v51 = vsub.f32 %v1537_v39, %v1540_v50 }
 0xc77   :  { %v1542_v52 = vmul.f32 1.442695, %v1541_v51 }
 0xc79   :  { %3485 = vpow2.f32 %v1542_v52  ;;  %v3038_v52 = vld [vmem:[#allocation6] ss:$0 sm:$0xff] }
 0xc83   :  { %v3486_v53 = vpop.eup %3485 }
 0xc84   :  { %v1544_v55 = vsel %vm494_vm4, %v3486_v53, 0.0 }
 0xc85   :  { %1545 = vadd.xlane.f32.xlu0 %v1544_v55 }
 0xcd5   :  { %v1707_v56 = vpop.xlane.xlu1 %1706 }
 0xcd6   :  { %v1708_v58 = vsub.f32 %v1704_v48, %v1707_v56 }
 0xcd8   :  { %v1709_v59 = vmul.f32 1.442695, %v1708_v58 }
 0xcd9   :  { %v1551_v60 = vpop.permute.xlu1 %1550 }
 0xcda   :  { %3487 = vpow2.f32 %v1709_v59  ;;  %3246 = vmatpush3.msra.mxu0 %v1551_v60 }
 0xcdb   :  { %3255 = vmatprep.subr.mxu0 %v3742_v57 }
 0xcdd   :  { %v1937_v9 = vpop.permute.xlu1 %1936 }
 0xce4   :  { %v3488_v61 = vpop.eup %3487 }
 0xce5   :  { %v1711_v63 = vsel %vm494_vm4, %v3488_v61, 0.0 }
 0xce6   :  { %1712 = vadd.xlane.f32.xlu0 %v1711_v63 }
 0xcfc   :  { %1938 = vrot.lane.b32.xlu0 %v1456_v29, %s3744_s14 }
 0xd12   :  { %v1546_v2 = vpop.xlane.xlu0 %1545 }
 0xd13   :  { %3489 = vrcp.f32 %v1546_v2 }
 0xd1d   :  { %v3490_v62 = vpop.eup %3489 }
 0xd1e   :  { %v1548_v3 = vmul.f32 %v3490_v62, %v3486_v53  ;;  %v2447_v62 = vld [vmem:[%s4387_s5] sm:$0xff] }
 0xd20   :  { %3248 = vmatmul.mubr.msk.f32.vlgmr.msra.gmra.mrb[12].mxu0 %vm494_vm4, %v1548_v3  ;;  %v2448_v3 = vld [vmem:[%s4387_s5 + $0x8] sm:$0xff] }
 0xd21   :  { %3256 = vmatpush3.msra.mxu0 %v1551_v60  ;;  %3257 = vmatprep.mubr.msk.f32.mxu0 %vm3743_vm3, %v3742_v57 }
 0xd22   :  { %3270 = vmatprep.subr.mxu0 %v3742_v57 }
 0xd73   :  { %v1713_v4 = vpop.xlane.xlu0 %1712 }
 0xd74   :  { %3491 = vrcp.f32 %v1713_v4  ;;  %v3385_v4 = vpack.c.bf16 %v2448_v3, %v2447_v62 }
 0xd77   :  { %v1939_v7 = vpop.permute.xlu0 %1938 }
 0xd7e   :  { %v3492_v5 = vpop.eup %3491 }
 0xd7f   :  { %v1715_v6 = vmul.f32 %v3492_v5, %v3488_v61  ;;  %v2578_v5 = vld [vmem:[%s4388_s6 + $0x8] sm:$0xff] }
 0xd81   :  { %3258 = vmatmul.mubr.msk.f32.vlgmr.msra.gmra.mrb[14].mxu0 %vm494_vm4, %v1715_v6 }
 0xd82   :  { %3271 = vmatpush3.xpose.msk.msra.mxu0 %vm494_vm4, %v1939_v7  ;;  %3272 = vmatprep.mubr.msk.f32.mxu0 %vm3743_vm3, %v3742_v57 }
 0xd83   :  { %3275 = vmatprep.subr.mxu0 %v3742_v57 }
 0xd85   :  { %3273 = vmatmul.mubr.msk.f32.vlgmr.msra.gmra.mrb[16].mxu0 %vm494_vm4, %v1937_v9  ;;  %v2450_v9 = vld [vmem:[%s4387_s5 + $0x18] sm:$0xff] }
 0xd86   :  { %3277 = vmatprep.mubr.msk.f32.mxu0 %vm3743_vm3, %v3742_v57 }
 0xdf3   :  { %v1622_v10 = vpop.f32.mrb[12].mxu0 }
 0xdf4   :  { %v3249_v11 = vpop.f32.mrb[13].mxu0 }
 0xdf5   :  { %v2579_v11 = vld [vmem:[%s4388_s6 + $0x10] sm:$0xff] }
 0xe54   :  { %v1785_v12 = vpop.f32.mrb[14].mxu0 }
 0xe55   :  { %v3259_v13 = vpop.f32.mrb[15].mxu0  ;;  %3263 = vmatmul.mubr.msk.f32.vlgmr.msra.gmra.mrb[16].mxu1 %vm494_vm4, %v1785_v12  ;;  %v2580_v12 = vld [vmem:[%s4388_s6 + $0x18] sm:$0xff] }
 0xe56   :  { %3266 = vmatpush3.msra.mxu1 %v4076_v44  ;;  %3267 = vmatprep.mubr.msk.f32.mxu1 %vm3743_vm3, %v3742_v57  ;;  %v3397_v13 = vpack.c.bf16 %v2580_v12, %v2579_v11 }
 0xe57   :  { %3280 = vmatprep.subr.mxu1 %v3742_v57 }
 0xe58   :  { %v2010_v14 = vpop.f32.mrb[16].mxu0 }
 0xe59   :  { %v2014_v15 = vmul.f32 0.35355338, %v2010_v14  ;;  %v3274_v16 = vpop.f32.mrb[17].mxu0  ;;  %v2656_v14 = vld [vmem:[%s4389_s7] sm:$0xff] }
 0xe5b   :  { %v2015_v17 = vsel %vm4033_vm5, %v2014_v15, 0.0  ;;  %v2657_v15 = vld [vmem:[%s4389_s7 + $0x8] sm:$0xff] }
 0xe5c   :  { %vm2016_vm12 = vcmp.eq.f32.partialorder %v2015_v17, 0.0  ;;  %v3401_v16 = vpack.c.bf16 %v2657_v15, %v2656_v14 }
 0xe5d   :  { %3268 = vmatmul.mubr.msk.f32.vlgmr.msra.gmra.mrb[16].mxu1 %vm494_vm4, %v1622_v10  ;;  %v2017_v18 = vsel %vm2016_vm12, -inf, %v2015_v17 }
 0xe5e   :  { %v2018_v19 = vsel %vm494_vm4, %v2017_v18, -inf  ;;  %3281 = vmatpush3.msra.mxu1 %v4098_v37  ;;  %3282 = vmatprep.mubr.msk.f32.mxu1 %vm3743_vm3, %v3742_v57 }
 0xe5f   :  { %2019 = vmax.xlane.f32.xlu1 %v2018_v19  ;;  %3290 = vmatprep.subr.mxu1 %v3742_v57 }
 0xe70   :  { %2180 = vrot.lane.b32.xlu1 %v4122_v20, %s3748_s2 }
 0xeec   :  { %v2020_v44 = vpop.xlane.xlu1 %2019 }
 0xeed   :  { %v2021_v21 = vsub.f32 %v2017_v18, %v2020_v44 }
 0xeef   :  { %v2022_v22 = vmul.f32 1.442695, %v2021_v21  ;;  %v2658_v21 = vld [vmem:[%s4389_s7 + $0x10] sm:$0xff] }
 0xef0   :  { %v2181_v20 = vpop.permute.xlu1 %2180 }
 0xef1   :  { %3493 = vpow2.f32 %v2022_v22  ;;  %v2659_v22 = vld [vmem:[%s4389_s7 + $0x18] sm:$0xff]  ;;  %s3675_s7 = scalar_lea.vmem %s2984_s13, 16 }
 0xef2   :  { %p3676_p0 = scmp.ne.s32.totalorder %s2984_s13, %s3675_s7  ;;  %p3681_p2 = scmp.lt.s32.totalorder %s3679_s30, %s3675_s7 }
 0xef4   :  { %p3682_p3 = por %p3681_p2, %p3680_p1 }
 0xef6   :  { %p3683_p4 = pnand %p3682_p3, %p3676_p0 }
 0xefb   :  { %v3494_v23 = vpop.eup %3493 }
 0xefc   :  { %v2024_v24 = vsel %vm494_vm4, %v3494_v23, 0.0 }
 0xefd   :  { %2025 = vadd.xlane.f32.xlu0 %v2024_v24 }
 0xf13   :  { %2029 = vrot.lane.b32.xlu0 %v3994_v38, %s3747_s28 }
 0xf8a   :  { %v2026_v37 = vpop.xlane.xlu0 %2025 }
 0xf8b   :  { %3495 = vrcp.f32 %v2026_v37  ;;  %v3405_v37 = vpack.c.bf16 %v2659_v22, %v2658_v21 }
 0xf8e   :  { %v2030_v25 = vpop.permute.xlu0 %2029 }
 0xf8f   :  { %3276 = vmatpush3.msra.mxu0 %v2030_v25 }
 0xf90   :  { %3285 = vmatprep.subr.mxu0 %v3742_v57 }
 0xf95   :  { %v3496_v26 = vpop.eup %3495 }
 0xf96   :  { %v2028_v27 = vmul.f32 %v3496_v26, %v3494_v23 }
 0xf98   :  { %3278 = vmatmul.mubr.msk.f32.vlgmr.msra.gmra.mrb[18].mxu0 %vm494_vm4, %v2028_v27 }
 0xf99   :  { %3286 = vmatpush3.xpose.msk.msra.mxu0 %vm494_vm4, %v1939_v7  ;;  %3287 = vmatprep.mubr.msk.f32.mxu0 %vm3743_vm3, %v3742_v57  ;;  %v2449_v7 = vld [vmem:[%s4387_s5 + $0x10] sm:$0xff] }
 0xf9a   :  { %3386 = vmatprep.subr.bf16.mxu0 %v3385_v4  ;;  %v3389_v10 = vpack.c.bf16 %v2450_v9, %v2449_v7 }
 0xf9c   :  { %3288 = vmatmul.mubr.msk.f32.vlgmr.msra.gmra.mrb[20].mxu0 %vm494_vm4, %v2181_v20 }
 0xf9d   :  { %3388 = vmatpush3.bf16.msra.mxu0 %v3385_v4 }
 0xf9e   :  { %3390 = vmatprep.subr.bf16.mxu0 %v3389_v10 }
 0xfa1   :  { %3392 = vmatpush3.bf16.msra.mxu0 %v3389_v10 }
 0xfa2   :  { %3402 = vmatprep.subr.bf16.mxu0 %v3401_v16 }
0x106b   :  { %v2101_v28 = vpop.f32.mrb[18].mxu0 }
0x106c   :  { %v3279_v38 = vpop.f32.mrb[19].mxu0  ;;  %3283 = vmatmul.mubr.msk.f32.vlgmr.msra.gmra.mrb[16].mxu1 %vm494_vm4, %v2101_v28 }
0x106d   :  { %3291 = vmatpush3.msra.mxu1 %v2030_v25  ;;  %3292 = vmatprep.mubr.msk.f32.mxu1 %vm3743_vm3, %v3742_v57 }
0x106e   :  { %3295 = vmatprep.subr.mxu1 %v3742_v57 }
0x106f   :  { %v2250_v29 = vpop.f32.mrb[20].mxu0 }
0x1070   :  { %v2254_v30 = vmul.f32 0.35355338, %v2250_v29  ;;  %v3289_v31 = vpop.f32.mrb[21].mxu0 }
0x1072   :  { %v2255_v32 = vsel %vm4033_vm5, %v2254_v30, 0.0  ;;  %vm2963_vm5 = vcmask 0  }
0x1073   :  { %vm2256_vm13 = vcmp.eq.f32.partialorder %v2255_v32, 0.0 }
0x1074   :  { %v2257_v33 = vsel %vm2256_vm13, -inf, %v2255_v32 }
0x1075   :  { %v2258_v34 = vsel %vm494_vm4, %v2257_v33, -inf }
0x1076   :  { %2259 = vmax.xlane.f32.xlu1 %v2258_v34 }
0x1103   :  { %v2260_v35 = vpop.xlane.xlu1 %2259 }
0x1104   :  { %v2261_v36 = vsub.f32 %v2257_v33, %v2260_v35 }
0x1106   :  { %v2262_v39 = vmul.f32 1.442695, %v2261_v36 }
0x1108   :  { %3497 = vpow2.f32 %v2262_v39 }
0x1112   :  { %v3498_v41 = vpop.eup %3497 }
0x1113   :  { %v2264_v43 = vsel %vm494_vm4, %v3498_v41, 0.0 }
0x1114   :  { %2265 = vadd.xlane.f32.xlu0 %v2264_v43 }
0x1118   :  { %2425 = vadd.xlane.f32.xlu0 %v2424_v45 }
0x11a1   :  { %v2266_v46 = vpop.xlane.xlu0 %2265 }
0x11a2   :  { %3499 = vrcp.f32 %v2266_v46 }
0x11a5   :  { %v2426_v47 = vpop.xlane.xlu0 %2425 }
0x11a6   :  { %v2430_v48 = vmul.f32 0.03125, %v2426_v47 }
0x11a8   :  { %v2433_v49 = vadd.f32 1e-06, %v2430_v48 }
0x11aa   :  { %3501 = vrsqrt.f32 %v2433_v49 }
0x11ac   :  { %v3500_v50 = vpop.eup %3499 }
0x11ad   :  { %v2268_v51 = vmul.f32 %v3500_v50, %v3498_v41 }
0x11af   :  { %3293 = vmatmul.mubr.msk.f32.vlgmr.msra.gmra.mrb[18].mxu1 %vm494_vm4, %v2268_v51 }
0x11b0   :  { %3296 = vmatpush3.msra.mxu1 %v4131_v54  ;;  %3297 = vmatprep.mubr.msk.f32.mxu1 %vm3743_vm3, %v3742_v57 }
0x11b4   :  { %v3502_v0 = vpop.eup %3501 }
0x11b5   :  { %v2437_v53 = vmul.f32 %v3502_v0, %v4214_v42 }
0x11b7   :  { %v2445_v55 = vmul.f32 %v3038_v52, %v2437_v53 }
0x11b9   :  { %3308 = vmatprep.mubr.msk.f32.mxu0 %vm152_vm0, %v2445_v55 }
0x1282   :  { %v2338_v56 = vpop.f32.mrb[18].mxu1 }
0x1283   :  { %v3294_v58 = vpop.f32.mrb[19].mxu1  ;;  %3298 = vmatmul.mubr.msk.f32.vlgmr.msra.gmra.mrb[16].mxu1 %vm494_vm4, %v2338_v56 }
0x1284   :  { %3319 = vmatprep.mubr.msk.f32.mxu1 %vm152_vm0, %v2445_v55 }
0x1356   :  { %v2412_v59 = vpop.f32.mrb[16].mxu1 }
0x1357   :  { %2417 = vst.msk [vmem:[#allocation5 + $0x8] sm:$0xff] %vm152_vm0, %v2412_v59  ;;  %v3299_v54 = vpop.f32.mrb[17].mxu1 }
0x135e   :  { %v2419_v60 = vld [vmem:[#allocation5 + $0x8] sm:$0xff] }
0x135f   :  { %v4230_v61 = vadd.f32 %v2419_v60, %v3948_v1  ;;  %v2577_v1 = vld [vmem:[%s4388_s6] sm:$0xff] }
0x1360   :  { %v3393_v6 = vpack.c.bf16 %v2578_v5, %v2577_v1 }
0x1361   :  { %v2423_v63 = vmul.f32 %v4230_v61, %v4230_v61 }
0x1362   :  { %3394 = vmatprep.subr.bf16.mxu1 %v3393_v6 }
0x1363   :  { %v2427_v2 = vsel %vm152_vm0, %v2423_v63, 0.0  ;;  %3396 = vmatpush3.bf16.msra.mxu1 %v3393_v6 }
0x1364   :  { %2428 = vadd.xlane.f32.xlu1 %v2427_v2  ;;  %3398 = vmatprep.subr.bf16.mxu1 %v3397_v13 }
0x1367   :  { %3400 = vmatpush3.bf16.msra.mxu1 %v3397_v13 }
0x13f1   :  { %v2429_v17 = vpop.xlane.xlu1 %2428 }
0x13f2   :  { %v2431_v18 = vmul.f32 0.03125, %v2429_v17 }
0x13f4   :  { %v2434_v19 = vadd.f32 1e-06, %v2431_v18 }
0x13f6   :  { %3503 = vrsqrt.f32 %v2434_v19 }
0x1400   :  { %v3504_v44 = vpop.eup %3503 }
0x1401   :  { %v2438_v23 = vmul.f32 %v3504_v44, %v4230_v61 }
0x1403   :  { %v2446_v24 = vmul.f32 %v3038_v52, %v2438_v23 }
0x1405   :  { %3309 = vmatmul.mubr.msk.f32.vlgmr.msra.gmra.mrb[22].mxu0 %vm152_vm0, %v2446_v24  ;;  %3320 = vmatmul.mubr.msk.f32.vlgmr.msra.gmra.mrb[20].mxu1 %vm152_vm0, %v2446_v24 }
0x1406   :  { %3404 = vmatpush3.bf16.msra.mxu0 %v3401_v16  ;;  %3330 = vmatprep.mubr.msk.f32.mxu0 %vm152_vm0, %v2445_v55 }
0x1407   :  { %3406 = vmatprep.subr.bf16.mxu0 %v3405_v37 }
0x140a   :  { %3408 = vmatpush3.bf16.msra.mxu0 %v3405_v37 }
0x140d   :  { %3331 = vmatmul.mubr.msk.f32.vlgmr.msra.gmra.mrb[24].mxu0 %vm152_vm0, %v2446_v24 }
0x14d8   :  { %v3310_v25 = vpop.f32.mrb[22].mxu0  ;;  %v3321_v26 = vpop.f32.mrb[20].mxu1 }
0x14d9   :  { %v3049_v27 = vmul.f32 -1.442695, %v3321_v26  ;;  %v2523_v20 = vpop.f32.mrb[23].mxu0  ;;  %v2647_v28 = vpop.f32.mrb[21].mxu1  ;;  %v2536_v38 = vsel %vm2532_vm14, %v3310_v25, -inf }
0x14da   :  { %v3048_v29 = vmul.f32 -1.442695, %v2647_v28  ;;  %2537 = vmax.xlane.f32.xlu1 %v2536_v38  ;;  %v2533_v30 = vsel %vm2532_vm14, %v2523_v20, -inf }
0x14db   :  { %3505 = vpow2.f32 %v3049_v27  ;;  %2534 = vmax.xlane.f32.xlu0 %v2533_v30  ;;  %v2839_v30 = vld [vmem:[%s4390_s8] sm:$0xff] }
0x14dc   :  { %3507 = vpow2.f32 %v3048_v29 }
0x14e0   :  { %v3332_v31 = vpop.f32.mrb[24].mxu0 }
0x14e1   :  { %v2726_v32 = vpop.f32.mrb[25].mxu0 }
0x14e5   :  { %v3506_v33 = vpop.eup %3505 }
0x14e6   :  { %v3508_v34 = vpop.eup %3507  ;;  %v2828_v35 = vadd.f32 1.0, %v3506_v33 }
0x14e7   :  { %v2827_v36 = vadd.f32 1.0, %v3508_v34  ;;  %v2842_v34 = vld [vmem:[%s4390_s8 + $0x18] sm:$0xff] }
0x14e8   :  { %3509 = vrcp.f32 %v2828_v35 }
0x14e9   :  { %3511 = vrcp.f32 %v2827_v36  ;;  %v2843_v36 = vld [vmem:[%s4390_s8 + $0x20] sm:$0xff] }
0x14f2   :  { %v3510_v39 = vpop.eup %3509 }
0x14f3   :  { %v3512_v40 = vpop.eup %3511  ;;  %v2834_v41 = vmul.f32 %v3510_v39, %v3321_v26  ;;  %v2844_v39 = vld [vmem:[%s4390_s8 + $0x28] sm:$0xff] }
0x14f4   :  { %v2833_v43 = vmul.f32 %v3512_v40, %v2647_v28  ;;  %v2735_v28 = vld [vmem:[#allocation9] sm:$0xf]  ;;  %v3417_v40 = vpack.c.bf16 %v2844_v39, %v2843_v36 }
0x14f5   :  { %v4278_v8 = vmul.f32 %v3332_v31, %v2834_v41  ;;  %3333 = vmatprep.subr.msk.mxu1 %vm2742_vm2, %v2735_v28  ;;  %v2840_v31 = vld [vmem:[%s4390_s8 + $0x8] sm:$0xff]  ;;  %v2845_v41 = vld [vmem:[%s4390_s8 + $0x30] sm:$0xff] }
0x14f6   :  { %v4280_v45 = vmul.f32 %v2833_v43, %v2726_v32  ;;  %3334 = vmatpush3.msk.msra.mxu1 %vm2742_vm2, %v2735_v28  ;;  %v2841_v32 = vld [vmem:[%s4390_s8 + $0x10] sm:$0xff]  ;;  %v3409_v33 = vpack.c.bf16 %v2840_v31, %v2839_v30  ;;  %v2846_v43 = vld [vmem:[%s4390_s8 + $0x38] sm:$0xff] }
0x14f7   :  { %v3413_v35 = vpack.c.bf16 %v2842_v34, %v2841_v32 }
0x14f8   :  { %3410 = vmatprep.subr.bf16.mxu0 %v3409_v33 }
0x14f9   :  { %3412 = vmatpush3.bf16.msra.mxu0 %v3409_v33 }
0x14fa   :  { %3414 = vmatprep.subr.bf16.mxu0 %v3413_v35 }
0x14fd   :  { %3416 = vmatpush3.bf16.msra.mxu0 %v3413_v35 }
0x14fe   :  { %3418 = vmatprep.subr.bf16.mxu0 %v3417_v40 }
0x1501   :  { %3420 = vmatpush3.bf16.msra.mxu0 %v3417_v40 }
0x1567   :  { %v2538_v46 = vpop.xlane.xlu1 %2537 }
0x1568   :  { %v2540_v47 = vsub.f32 %v3310_v25, %v2538_v46  ;;  %v2535_v48 = vpop.xlane.xlu0 %2534  ;;  %v3421_v46 = vpack.c.bf16 %v2846_v43, %v2845_v41 }
0x1569   :  { %v2539_v49 = vsub.f32 %v2523_v20, %v2535_v48  ;;  %v2848_v48 = vld [vmem:[%s4390_s8 + $0x48] sm:$0xff] }
0x156a   :  { %v2543_v50 = vmul.f32 1.442695, %v2540_v47  ;;  %v2847_v47 = vld [vmem:[%s4390_s8 + $0x40] sm:$0xff]  ;;  %3422 = vmatprep.subr.bf16.mxu0 %v3421_v46 }
0x156b   :  { %v2541_v51 = vmul.f32 1.442695, %v2539_v49  ;;  %v3425_v49 = vpack.c.bf16 %v2848_v48, %v2847_v47  ;;  %3424 = vmatpush3.bf16.msra.mxu0 %v3421_v46 }
0x156c   :  { %3513 = vpow2.f32 %v2543_v50 }
0x156d   :  { %3515 = vpow2.f32 %v2541_v51  ;;  %3426 = vmatprep.subr.bf16.mxu0 %v3425_v49 }
0x156f   :  { %3428 = vmatpush3.bf16.msra.mxu0 %v3425_v49 }
0x1576   :  { %v3514_v0 = vpop.eup %3513 }
0x1577   :  { %v3516_v52 = vpop.eup %3515  ;;  %v2548_v53 = vsel %vm2532_vm14, %v3514_v0, 0.0 }
0x1578   :  { %2549 = vadd.xlane.f32.xlu1 %v2548_v53  ;;  %v2545_v55 = vsel %vm2532_vm14, %v3516_v52, 0.0 }
0x1579   :  { %2546 = vadd.xlane.f32.xlu0 %v2545_v55 }
0x1605   :  { %v2550_v56 = vpop.xlane.xlu1 %2549 }
0x1606   :  { %3517 = vrcp.f32 %v2550_v56  ;;  %v2547_v58 = vpop.xlane.xlu0 %2546  ;;  %v2849_v56 = vld [vmem:[%s4390_s8 + $0x50] sm:$0xff] }
0x1607   :  { %3519 = vrcp.f32 %v2547_v58  ;;  %v2850_v58 = vld [vmem:[%s4390_s8 + $0x58] sm:$0xff] }
0x1610   :  { %v3518_v59 = vpop.eup %3517 }
0x1611   :  { %v3520_v54 = vpop.eup %3519  ;;  %v4284_v60 = vmul.f32 %v3518_v59, %v3514_v0  ;;  %v3429_v59 = vpack.c.bf16 %v2850_v58, %v2849_v56 }
0x1612   :  { %v4286_v63 = vmul.f32 %v3520_v54, %v3516_v52 }
0x1613   :  { %v2558_v2 = vsel %vm2532_vm14, %v4284_v60, -inf  ;;  %v2949_v4 = vsel %vm2532_vm14, %v4284_v60, 0.0  ;;  %3430 = vmatprep.subr.bf16.mxu0 %v3429_v59 }
0x1614   :  { %2559 = vmax.xlane.f32.xlu1 %v2558_v2  ;;  %v2555_v62 = vsel %vm2532_vm14, %v4286_v63, -inf  ;;  %v2948_v3 = vsel %vm2532_vm14, %v4286_v63, 0.0  ;;  %3432 = vmatpush3.bf16.msra.mxu0 %v3429_v59 }
0x1615   :  { %2556 = vmax.xlane.f32.xlu0 %v2555_v62  ;;  %v2950_v1 = vadd.f32 %v2949_v4, %v2948_v3 }
0x1617   :  { %v2951_v5 = vrot.slane %v2950_v1, 4 }
0x1619   :  { %v2952_v6 = vadd.f32 %v2951_v5, %v2950_v1 }
0x161b   :  { %v2953_v12 = vrot.slane %v2952_v6, 2 }
0x161d   :  { %v2954_v21 = vadd.f32 %v2953_v12, %v2952_v6 }
0x161f   :  { %v2955_v24 = vrot.slane %v2954_v21, 1 }
0x1621   :  { %v2956_v26 = vadd.f32 %v2955_v24, %v2954_v21 }
0x1623   :  { %v2957_v20 = vmul.f32 0.0625, %v2956_v26 }
0x16a1   :  { %v2560_v7 = vpop.xlane.xlu1 %2559 }
0x16a2   :  { %vm2562_vm15 = vcmp.eq.f32.partialorder %v4284_v60, %v2560_v7  ;;  %v2557_v9 = vpop.xlane.xlu0 %2556 }
0x16a3   :  { %v2564_v10 = vsel %vm2562_vm15, 1.0, %v3742_v57  ;;  %vm2561_vm1 = vcmp.eq.f32.partialorder %v4286_v63, %v2557_v9  ;;  %v2566_v11 = vsel %vm2562_vm15, -inf, %v4284_v60 }
0x16a4   :  { %v2938_v13 = vsel %vm2532_vm14, %v2564_v10, 0.0  ;;  %v2563_v14 = vsel %vm2561_vm1, 1.0, %v3742_v57  ;;  %v2570_v15 = vsel %vm2532_vm14, %v2566_v11, -inf  ;;  %v2565_v16 = vsel %vm2561_vm1, -inf, %v4286_v63 }
0x16a5   :  { %v2937_v17 = vsel %vm2532_vm14, %v2563_v14, 0.0  ;;  %2571 = vmax.xlane.f32.xlu1 %v2570_v15  ;;  %v2567_v18 = vsel %vm2532_vm14, %v2565_v16, -inf }
0x16a6   :  { %v2939_v19 = vadd.f32 %v2938_v13, %v2937_v17  ;;  %2568 = vmax.xlane.f32.xlu0 %v2567_v18 }
0x16a8   :  { %v2940_v44 = vrot.slane %v2939_v19, 4 }
0x16aa   :  { %v2941_v22 = vadd.f32 %v2940_v44, %v2939_v19 }
0x16ac   :  { %v2942_v23 = vrot.slane %v2941_v22, 2 }
0x16ae   :  { %v2943_v37 = vadd.f32 %v2942_v23, %v2941_v22 }
0x16b0   :  { %v2944_v25 = vrot.slane %v2943_v37, 1 }
0x16b2   :  { %v2945_v57 = vadd.f32 %v2944_v25, %v2943_v37 }
0x16b4   :  { %v2947_v27 = vmul.f32 0.0625, %v2945_v57 }
0x16b6   :  { %v2958_v38 = vmul.f32 %v2957_v20, %v2947_v27 }
0x16b8   :  { %v2959_v29 = vsel %vm2532_vm14, %v2958_v38, 0.0 }
0x16b9   :  { %2960 = vadd.xlane.f32.xlu0 %v2959_v29 }
0x1732   :  { %v2572_v50 = vpop.xlane.xlu1 %2571 }
0x1733   :  { %vm2574_vm3 = vcmp.ge.f32.partialorder %v4284_v60, %v2572_v50  ;;  %v2569_v51 = vpop.xlane.xlu0 %2568 }
0x1734   :  { %vm2573_vm4 = vcmp.ge.f32.partialorder %v4286_v63, %v2569_v51  ;;  %v2576_v52 = vsel %vm2574_vm3, %v4284_v60, 0.0 }
0x1735   :  { %v2575_v0 = vsel %vm2573_vm4, %v4286_v63, 0.0 }
0x1736   :  { %3335 = vmatprep.mubr.msk.f32.mxu1 %vm2532_vm14, %v2575_v0 }
0x1737   :  { %3336 = vmatmul.mubr.msk.f32.vlgmr.msra.gmra.mrb[22].mxu1 %vm2532_vm14, %v2576_v52 }
0x1746   :  { %v2961_v53 = vpop.xlane.xlu0 %2960 }
0x1747   :  { %v2962_v55 = vmul.f32 0.04, %v2961_v53 }
0x1749   :  { %2964 = vst.msk [vmem:[#allocation19] sm:$0x1] %vm2963_vm5, %v2962_v55 }
0x180a   :  { %v3337_v54 = vpop.f32.mrb[22].mxu1 }
0x180b   :  { %v2838_v60 = vmul.f32 %v3337_v54, %v4278_v8  ;;  %v2812_v63 = vpop.f32.mrb[23].mxu1 }
0x180c   :  { %v2837_v2 = vmul.f32 %v4280_v45, %v2812_v63 }
0x180e   :  { %3362 = vmatprep.mubr.msk.f32.mxu0 %vm2851_vm6, %v2837_v2 }
0x180f   :  { %3363 = vmatmul.mubr.msk.f32.vlgmr.msra.gmra.mrb[26].mxu0 %vm2851_vm6, %v2838_v60 }
0x1810   :  { %3686 = shalt.err (!%p3683_p4)
}
0x1811   :  { %s3687_s9 = scalar_lea.hbm %s4399_s17, 16 }
0x1812   :  { %p3688_p5 = scmp.ne.s32.totalorder %s4399_s17, %s3687_s9  ;;  %p3691_p6 = scmp.lt.u32.totalorder %s3687_s9, %s4399_s17 }
0x1814   :  { %p3693_p7 = pnand %p3691_p6, %p3688_p5 }
0x1816   :  { %3696 = shalt.err (!%p3693_p7)
}
0x1817   :  { %2986 = dma.vmem_to_hbm [thread:$0]  %s2984_s13, 16, %s4399_s17, [#allocation20]  }
0x1818   :  { %s3750_s21 = smov [#allocation18]  }
0x1819   :  { %s2970_s23 = sshll.u32 %s3750_s21, 4  ;;  %s2971_s23 = int_to_ptr.vmem [resolvable:$true] %s2970_s23 }
0x181a   :  { %s3697_s14 = scalar_lea.vmem %s2971_s23, 256  ;;  %p3702_p9 = scmp.lt.s32.totalorder %s2971_s23, %s2971_s23 }
0x181b   :  { %p3698_p8 = scmp.ne.s32.totalorder %s2971_s23, %s3697_s14  ;;  %p3703_p10 = scmp.lt.s32.totalorder %s3697_s14, %s3697_s14 }
0x181d   :  { %p3704_p11 = por %p3703_p10, %p3702_p9 }
0x181f   :  { %p3705_p12 = pnand %p3704_p11, %p3698_p8 }
0x18e2   :  { %v3364_v8 = vpop.f32.mrb[26].mxu0 }
0x18e3   :  { %v2934_v45 = vadd.f32 %v3364_v8, %v4230_v61  ;;  %v2924_v62 = vpop.f32.mrb[27].mxu0 }
0x18e4   :  { %v2933_v3 = vadd.f32 %v2924_v62, %v4214_v42 }
0x18e5   :  { %2936 = vst.msk [vmem:[#allocation18 + $0x8] sm:$0xff] %vm152_vm0, %v2934_v45 }
0x18e6   :  { %2935 = vst.msk [vmem:[#allocation18] sm:$0xff] %vm152_vm0, %v2933_v3 }
0x18e7   :  { %3708 = shalt.err (!%p3705_p12)
}
0x18e8   :  { %s3709_s24 = scalar_lea.hbm %s4398_s16, 256 }
0x18e9   :  { %p3710_p13 = scmp.ne.s32.totalorder %s4398_s16, %s3709_s24  ;;  %p3713_p0 = scmp.lt.u32.totalorder %s3709_s24, %s4398_s16 }
0x18eb   :  { %p3715_p1 = pnand %p3713_p0, %p3710_p13 }
0x18ed   :  { %3718 = shalt.err (!%p3715_p1)
}
0x18ee   :  { %2976 = dma.vmem_to_hbm [thread:$0]  %s2971_s23, 256, %s4398_s16, [#allocation8], %s3734_s25, %s3734_s25, %s3735_s19  }
0x18ef   :  { %3727 = dma.done.wait [#allocation8], 256  }
0x18f0   :  { %3728 = vsyncadd [#allocation8], 4294967040 }
0x18f1   :  { %3729 = dma.done.wait [#allocation20], 16  }
0x18f2   :  { %3730 = vsyncadd [#allocation20], 4294967280 }
0x18f3   :  { %2993 = vsyncpa [#allocation7], 1 }
0x18f4   :  { %2994 = vsyncpa [#allocation10], 1 }
0x18f5   :  { %2995 = vsyncpa [#allocation13], 1 }
0x18f6   :  { %2996 = vsyncpa [#allocation16], 1 }
0x18f7   :  { %2997 = vsyncpa [#allocation8], 1 }
0x18f8   :  { %2998 = vsyncpa [#allocation20], 1 }

</bundles_post_ra>
